<compile_context>
chip_gen: v5e
topology: v5e:2x2
jax: 0.10.0
libtpu: 0.0.40
codegen_flags: <defaults>
</compile_context>

<pallas_src>
import math

import jax
import jax.numpy as jnp
from jax import lax
from jax.experimental import pallas as pl
from jax.experimental.pallas import tpu as pltpu

# ---------------------------------------------------------------------------
# Geometry (fixed by the module's hyper-parameters)
# ---------------------------------------------------------------------------
CIN, CMID, COUT = 2, 14, 22
H_IN = 11                        # input spatial size (square)
S, K1, PAD1, OPAD = 2, 3, 0, 1   # ConvTranspose2d(2, 14, 3, stride=2, out_pad=1)
K2, PAD2 = 2, 1                  # DeformConv2d(14, 22, 2, stride=1, padding=1)

PW1 = (H_IN - 1) * S + 1 + 2 * (K1 - 1 - PAD1) + OPAD  # 26: dilated+padded input width
H1 = PW1 - K1 + 1                                      # 24: convT output height/width
PW2 = H1 + 2 * PAD2                                    # 26: padded intermediate width
HO = PW2 - K2 + 1                                      # 25: final output height/width
assert PW1 == PW2

ROWS2 = PW2 + 1                  # 27: one spill row keeps flat layer-2 tap windows in bounds
FLAT2 = ROWS2 * PW2              # 702: flat padded layer-2 grid (layer 1 is computed here too)
M2 = HO * PW2                    # 650: flat layer-2 output grid (1 throw-away col per row)
LEAD = PAD2 * PW2 + PAD2         # 27: leading zeros so layer-1 taps at position 0 stay in bounds
XFLAT = FLAT2 + (K1 - 1) * PW2 + (K1 - 1)              # 756: extended flat input length

CINP = 8                         # input channels padded to one sublane group
CMID_P = 16                      # intermediate channels padded to two sublane groups


# ---------------------------------------------------------------------------
# Kernel
# ---------------------------------------------------------------------------
def _make_kernel(b_tile):
    def kernel(x_ref, mask_ref, w1_ref, b1_ref, w2_ref, b2_ref, out_ref, y_ref):
        w1 = w1_ref[...]            # (16, 72)   taps folded into contraction dim
        b1 = b1_ref[...]            # (16, 1)
        w2 = w2_ref[...]            # (22, 64)
        b2 = b2_ref[...]            # (22, 1)
        mask = mask_ref[...]        # (1, 702)   zeroes the pad ring / throw-away cols

        for s in range(b_tile):     # unrolled over the batch tile
            # ---- layer 1: convT as dense conv, all 9 taps in ONE MXU pass ----
            win1 = jnp.concatenate(
                [x_ref[s, :, pl.ds(i * PW2 + j, FLAT2)]
                 for i in range(K1) for j in range(K1)], axis=0)      # (72, 702)
            y1 = jnp.tanh(jnp.dot(w1, win1, preferred_element_type=jnp.float32) + b1)
            # single full-width, 0-offset aligned store of the padded intermediate
            y_ref[...] = y1 * mask                                    # (16, 702)

            # ---- layer 2: 2x2 conv (deform conv, zero offsets), 4 taps folded ----
            # TODO(synk): DeformConv2d is called without an offset tensor in the
            # PyTorch module, so it is lowered as a standard conv (zero offsets).
            win2 = jnp.concatenate(
                [y_ref[:, pl.ds(i * PW2 + j, M2)]
                 for i in range(K2) for j in range(K2)], axis=0)      # (64, 650)
            o = jnp.tanh(jnp.dot(w2, win2, preferred_element_type=jnp.float32) + b2)
            out_ref[s] = o                                            # one 650-lane bulk store
    return kernel


# ---------------------------------------------------------------------------
# Wrapper
# ---------------------------------------------------------------------------
def _prep_weights(params):
    w_ct, b_ct, w_dc, b_dc = params
    # convT == dense conv over the dilated input with the flipped, channel-swapped kernel
    w1c = jnp.flip(w_ct, (2, 3)).transpose(1, 0, 2, 3)                # (14, 2, 3, 3)
    w1t = jnp.transpose(w1c, (0, 2, 3, 1))                            # (14, 3, 3, 2)
    w1t = jnp.pad(w1t, ((0, CMID_P - CMID), (0, 0), (0, 0), (0, CINP - CIN)))
    w1m = w1t.reshape(CMID_P, K1 * K1 * CINP)                         # (16, 72)
    b1 = jnp.pad(b_ct, (0, CMID_P - CMID)).reshape(CMID_P, 1)

    w2t = jnp.transpose(w_dc, (0, 2, 3, 1))                           # (22, 2, 2, 14)
    w2t = jnp.pad(w2t, ((0, 0), (0, 0), (0, 0), (0, CMID_P - CMID)))
    w2m = w2t.reshape(COUT, K2 * K2 * CMID_P)                         # (22, 64)
    b2 = b_dc.reshape(COUT, 1)
    return w1m, b1, w2m, b2


@jax.jit
def model_forward(x, params):
    n = x.shape[0]
    w1m, b1, w2m, b2 = _prep_weights(params)

    # stride-2 zero insertion + equivalent-conv padding, as a single XLA pad
    lo = K1 - 1 - PAD1
    hi = K1 - 1 - PAD1 + OPAD
    xdp = lax.pad(x, jnp.array(0.0, x.dtype),
                  ((0, 0, 0), (0, 0, 0), (lo, hi, S - 1), (lo, hi, S - 1)))  # (n, 2, 26, 26)
    x_flat = xdp.reshape(n, CIN, PW1 * PW1)                                  # (n, 2, 676)

    # batch tiling: several samples per grid step
    b_tile = min(n, 16)
    n_pad = -(-n // b_tile) * b_tile
    # pad: batch -> multiple of tile, channels -> 8, flat -> 27 leading + trailing spill
    x_ext = jnp.pad(x_flat, ((0, n_pad - n), (0, CINP - CIN),
                             (LEAD, XFLAT - LEAD - PW1 * PW1)))              # (n_pad, 8, 756)

    # validity mask on the 702-lane padded layer-2 grid: rows/cols 1..24 only
    pos = jnp.arange(FLAT2)
    r, c = pos // PW2, pos % PW2
    mask = (((r >= PAD2) & (r <= H1) & (c >= PAD2) & (c <= H1))
            .astype(jnp.float32).reshape(1, FLAT2))

    flops = 2 * n_pad * (CMID_P * CINP * K1 * K1 * FLAT2 + COUT * CMID_P * K2 * K2 * M2)
    transc = n_pad * (CMID_P * FLAT2 + COUT * M2)
    bytes_acc = 4 * (n_pad * (CINP * XFLAT + COUT * M2) + FLAT2
                     + CMID_P * (CINP * K1 * K1 + 1) + COUT * (CMID_P * K2 * K2 + 1))

    out = pl.pallas_call(
        _make_kernel(b_tile),
        out_shape=jax.ShapeDtypeStruct((n_pad, COUT, M2), jnp.float32),
        grid=(n_pad // b_tile,),
        in_specs=[
            pl.BlockSpec((b_tile, CINP, XFLAT), lambda g: (g, 0, 0)),
            pl.BlockSpec((1, FLAT2), lambda g: (0, 0)),
            pl.BlockSpec((CMID_P, CINP * K1 * K1), lambda g: (0, 0)),
            pl.BlockSpec((CMID_P, 1), lambda g: (0, 0)),
            pl.BlockSpec((COUT, CMID_P * K2 * K2), lambda g: (0, 0)),
            pl.BlockSpec((COUT, 1), lambda g: (0, 0)),
        ],
        out_specs=pl.BlockSpec((b_tile, COUT, M2), lambda g: (g, 0, 0)),
        scratch_shapes=[pltpu.VMEM((CMID_P, FLAT2), jnp.float32)],
        compiler_params=pltpu.CompilerParams(dimension_semantics=("parallel",)),
        cost_estimate=pl.CostEstimate(flops=flops, transcendentals=transc,
                                      bytes_accessed=bytes_acc),
    )(x_ext, mask, w1m, b1, w2m, b2)

    # lane-dense kernel output is row-padded (25 x 26); compact 26->25 cols here
    out = out[:n].reshape(n, COUT, HO, PW2)[..., :HO]
    # TODO(synk): `v5 = self.convtranspose4(v4)` in the PyTorch module uses a tensor
    # built from the nonexistent `.offset` attribute and calls a tensor -- not
    # executable in PyTorch either; the last well-defined value (v4) is returned.
    return out


# ---------------------------------------------------------------------------
# Params + pure-XLA reference (for correctness checking)
# ---------------------------------------------------------------------------
def init_params(key):
    k1, k2, k3, k4 = jax.random.split(key, 4)
    bound1 = 1.0 / math.sqrt(CIN * K1 * K1)
    w_ct = jax.random.uniform(k1, (CIN, CMID, K1, K1), jnp.float32, -bound1, bound1)
    b_ct = jax.random.uniform(k2, (CMID,), jnp.float32, -bound1, bound1)
    bound2 = 1.0 / math.sqrt(CMID * K2 * K2)
    w_dc = jax.random.uniform(k3, (COUT, CMID, K2, K2), jnp.float32, -bound2, bound2)
    b_dc = jax.random.uniform(k4, (COUT,), jnp.float32, -bound2, bound2)
    return (w_ct, b_ct, w_dc, b_dc)


def reference_forward(x, params):
    w_ct, b_ct, w_dc, b_dc = params
    w1c = jnp.flip(w_ct, (2, 3)).transpose(1, 0, 2, 3)
    lo, hi = K1 - 1 - PAD1, K1 - 1 - PAD1 + OPAD
    v1 = lax.conv_general_dilated(
        x, w1c, window_strides=(1, 1), padding=((lo, hi), (lo, hi)),
        lhs_dilation=(S, S), dimension_numbers=("NCHW", "OIHW", "NCHW"),
        precision=lax.Precision.HIGHEST) + b_ct.reshape(1, CMID, 1, 1)
    v2 = jnp.tanh(v1)
    v3 = lax.conv_general_dilated(
        v2, w_dc, window_strides=(1, 1), padding=((PAD2, PAD2), (PAD2, PAD2)),
        dimension_numbers=("NCHW", "OIHW", "NCHW"),
        precision=lax.Precision.HIGHEST) + b_dc.reshape(1, COUT, 1, 1)
    return jnp.tanh(v3)


if __name__ == "__main__":
    key = jax.random.PRNGKey(0)
    kx, kp = jax.random.split(key)
    N = 2
    x = jax.random.normal(kx, (N, CIN, H_IN, H_IN), jnp.float32)   # module uses (*, 2, 11, 11)
    params = init_params(kp)

    out = jax.block_until_ready(model_forward(x, params))
    assert out.shape == (N, COUT, HO, HO), out.shape

    ref = reference_forward(x, params)
    err = float(jnp.max(jnp.abs(out - ref)))
    assert bool(jnp.allclose(out, ref, atol=1e-5, rtol=1e-5)), err
    print("KERNEL_OK")
</pallas_src>

<mosaic_0001>
module attributes {stable_mosaic.version = 11 : i64} {
  func.func @kernel(%arg0: i32, %arg1: memref<2x8x756xf32, #tpu.memory_space<vmem>>, %arg2: memref<1x702xf32, #tpu.memory_space<vmem>>, %arg3: memref<16x72xf32, #tpu.memory_space<vmem>>, %arg4: memref<16x1xf32, #tpu.memory_space<vmem>>, %arg5: memref<22x64xf32, #tpu.memory_space<vmem>>, %arg6: memref<22x1xf32, #tpu.memory_space<vmem>>, %arg7: memref<2x22x650xf32, #tpu.memory_space<vmem>>, %arg8: memref<16x702xf32, #tpu.memory_space<vmem>>) attributes {dimension_semantics = [#tpu.dimension_semantics<parallel>], iteration_bounds = array<i64: 1>, scalar_prefetch = 0 : i64, scratch_operands = 1 : i64, tpu.core_type = #tpu.core_type<tc>, window_params = [{transform_indices = @transform_0, window_bounds = array<i64: 2, 8, 756>}, {pipeline_mode = #tpu.pipeline_mode<synchronous>, transform_indices = @transform_1, window_bounds = array<i64: 1, 702>}, {pipeline_mode = #tpu.pipeline_mode<synchronous>, transform_indices = @transform_2, window_bounds = array<i64: 16, 72>}, {pipeline_mode = #tpu.pipeline_mode<synchronous>, transform_indices = @transform_3, window_bounds = array<i64: 16, 1>}, {pipeline_mode = #tpu.pipeline_mode<synchronous>, transform_indices = @transform_4, window_bounds = array<i64: 22, 64>}, {pipeline_mode = #tpu.pipeline_mode<synchronous>, transform_indices = @transform_5, window_bounds = array<i64: 22, 1>}, {transform_indices = @transform_6, window_bounds = array<i64: 2, 22, 650>}]} {
    %c0 = arith.constant 0 : index
    %c0_0 = arith.constant 0 : index
    %0 = vector.load %arg3[%c0, %c0_0] : memref<16x72xf32, #tpu.memory_space<vmem>>, vector<16x72xf32>
    %c0_1 = arith.constant 0 : index
    %c0_2 = arith.constant 0 : index
    %1 = vector.load %arg4[%c0_1, %c0_2] : memref<16x1xf32, #tpu.memory_space<vmem>>, vector<16x1xf32>
    %c0_3 = arith.constant 0 : index
    %c0_4 = arith.constant 0 : index
    %2 = vector.load %arg5[%c0_3, %c0_4] : memref<22x64xf32, #tpu.memory_space<vmem>>, vector<22x64xf32>
    %c0_5 = arith.constant 0 : index
    %c0_6 = arith.constant 0 : index
    %3 = vector.load %arg6[%c0_5, %c0_6] : memref<22x1xf32, #tpu.memory_space<vmem>>, vector<22x1xf32>
    %c0_7 = arith.constant 0 : index
    %c0_8 = arith.constant 0 : index
    %4 = vector.load %arg2[%c0_7, %c0_8] : memref<1x702xf32, #tpu.memory_space<vmem>>, vector<1x702xf32>
    %c0_9 = arith.constant 0 : index
    %c0_10 = arith.constant 0 : index
    %c0_11 = arith.constant 0 : index
    %5 = vector.load %arg1[%c0_9, %c0_10, %c0_11] : memref<2x8x756xf32, #tpu.memory_space<vmem>>, vector<1x8x702xf32>
    %6 = vector.shape_cast %5 : vector<1x8x702xf32> to vector<8x702xf32>
    %c0_12 = arith.constant 0 : index
    %c0_13 = arith.constant 0 : index
    %c1 = arith.constant 1 : index
    %7 = vector.load %arg1[%c0_12, %c0_13, %c1] : memref<2x8x756xf32, #tpu.memory_space<vmem>>, vector<1x8x702xf32>
    %8 = vector.shape_cast %7 : vector<1x8x702xf32> to vector<8x702xf32>
    %c0_14 = arith.constant 0 : index
    %c0_15 = arith.constant 0 : index
    %c2 = arith.constant 2 : index
    %9 = vector.load %arg1[%c0_14, %c0_15, %c2] : memref<2x8x756xf32, #tpu.memory_space<vmem>>, vector<1x8x702xf32>
    %10 = vector.shape_cast %9 : vector<1x8x702xf32> to vector<8x702xf32>
    %c0_16 = arith.constant 0 : index
    %c0_17 = arith.constant 0 : index
    %c26 = arith.constant 26 : index
    %11 = vector.load %arg1[%c0_16, %c0_17, %c26] : memref<2x8x756xf32, #tpu.memory_space<vmem>>, vector<1x8x702xf32>
    %12 = vector.shape_cast %11 : vector<1x8x702xf32> to vector<8x702xf32>
    %c0_18 = arith.constant 0 : index
    %c0_19 = arith.constant 0 : index
    %c27 = arith.constant 27 : index
    %13 = vector.load %arg1[%c0_18, %c0_19, %c27] : memref<2x8x756xf32, #tpu.memory_space<vmem>>, vector<1x8x702xf32>
    %14 = vector.shape_cast %13 : vector<1x8x702xf32> to vector<8x702xf32>
    %c0_20 = arith.constant 0 : index
    %c0_21 = arith.constant 0 : index
    %c28 = arith.constant 28 : index
    %15 = vector.load %arg1[%c0_20, %c0_21, %c28] : memref<2x8x756xf32, #tpu.memory_space<vmem>>, vector<1x8x702xf32>
    %16 = vector.shape_cast %15 : vector<1x8x702xf32> to vector<8x702xf32>
    %c0_22 = arith.constant 0 : index
    %c0_23 = arith.constant 0 : index
    %c52 = arith.constant 52 : index
    %17 = vector.load %arg1[%c0_22, %c0_23, %c52] : memref<2x8x756xf32, #tpu.memory_space<vmem>>, vector<1x8x702xf32>
    %18 = vector.shape_cast %17 : vector<1x8x702xf32> to vector<8x702xf32>
    %c0_24 = arith.constant 0 : index
    %c0_25 = arith.constant 0 : index
    %c53 = arith.constant 53 : index
    %19 = vector.load %arg1[%c0_24, %c0_25, %c53] : memref<2x8x756xf32, #tpu.memory_space<vmem>>, vector<1x8x702xf32>
    %20 = vector.shape_cast %19 : vector<1x8x702xf32> to vector<8x702xf32>
    %c0_26 = arith.constant 0 : index
    %c0_27 = arith.constant 0 : index
    %c54 = arith.constant 54 : index
    %21 = vector.load %arg1[%c0_26, %c0_27, %c54] : memref<2x8x756xf32, #tpu.memory_space<vmem>>, vector<1x8x702xf32>
    %22 = vector.shape_cast %21 : vector<1x8x702xf32> to vector<8x702xf32>
    %23 = tpu.concatenate %6, %8, %10, %12, %14, %16, %18, %20, %22 in 0 : vector<8x702xf32>, vector<8x702xf32>, vector<8x702xf32>, vector<8x702xf32>, vector<8x702xf32>, vector<8x702xf32>, vector<8x702xf32>, vector<8x702xf32>, vector<8x702xf32> -> vector<72x702xf32>
    %cst = arith.constant dense<0.000000e+00> : vector<16x702xf32>
    %24 = tpu.matmul %0, %23, %cst {dimension_numbers = #tpu.dot_dimension_numbers<[1], [0], [0], [1], [0, 0, 1, 1], [], []>} : vector<16x72xf32>, vector<72x702xf32>, vector<16x702xf32> -> vector<16x702xf32>
    %25 = vector.broadcast %1 : vector<16x1xf32> to vector<16x702xf32>
    %26 = arith.addf %24, %25 : vector<16x702xf32>
    %27 = math.tanh %26 : vector<16x702xf32>
    %28 = vector.broadcast %4 : vector<1x702xf32> to vector<16x702xf32>
    %29 = arith.mulf %27, %28 : vector<16x702xf32>
    %c0_28 = arith.constant 0 : index
    %c0_29 = arith.constant 0 : index
    %30 = vector.load %arg8[%c0_28, %c0_29] : memref<16x702xf32, #tpu.memory_space<vmem>>, vector<16x702xf32>
    tpu.vector_store %arg8[%c0_28, %c0_29], %29 {strides = array<i32>} : memref<16x702xf32, #tpu.memory_space<vmem>>, vector<16x702xf32>,
    %c0_30 = arith.constant 0 : index
    %c0_31 = arith.constant 0 : index
    %31 = vector.load %arg8[%c0_30, %c0_31] : memref<16x702xf32, #tpu.memory_space<vmem>>, vector<16x650xf32>
    %c0_32 = arith.constant 0 : index
    %c1_33 = arith.constant 1 : index
    %32 = vector.load %arg8[%c0_32, %c1_33] : memref<16x702xf32, #tpu.memory_space<vmem>>, vector<16x650xf32>
    %c0_34 = arith.constant 0 : index
    %c26_35 = arith.constant 26 : index
    %33 = vector.load %arg8[%c0_34, %c26_35] : memref<16x702xf32, #tpu.memory_space<vmem>>, vector<16x650xf32>
    %c0_36 = arith.constant 0 : index
    %c27_37 = arith.constant 27 : index
    %34 = vector.load %arg8[%c0_36, %c27_37] : memref<16x702xf32, #tpu.memory_space<vmem>>, vector<16x650xf32>
    %35 = tpu.concatenate %31, %32, %33, %34 in 0 : vector<16x650xf32>, vector<16x650xf32>, vector<16x650xf32>, vector<16x650xf32> -> vector<64x650xf32>
    %cst_38 = arith.constant dense<0.000000e+00> : vector<22x650xf32>
    %36 = tpu.matmul %2, %35, %cst_38 {dimension_numbers = #tpu.dot_dimension_numbers<[1], [0], [0], [1], [0, 0, 1, 1], [], []>} : vector<22x64xf32>, vector<64x650xf32>, vector<22x650xf32> -> vector<22x650xf32>
    %37 = vector.broadcast %3 : vector<22x1xf32> to vector<22x650xf32>
    %38 = arith.addf %36, %37 : vector<22x650xf32>
    %39 = math.tanh %38 : vector<22x650xf32>
    %c0_39 = arith.constant 0 : index
    %c0_40 = arith.constant 0 : index
    %c0_41 = arith.constant 0 : index
    %40 = vector.load %arg7[%c0_39, %c0_40, %c0_41] : memref<2x22x650xf32, #tpu.memory_space<vmem>>, vector<1x22x650xf32>
    %41 = vector.shape_cast %40 : vector<1x22x650xf32> to vector<22x650xf32>
    %42 = vector.shape_cast %39 : vector<22x650xf32> to vector<1x22x650xf32>
    tpu.vector_store %arg7[%c0_39, %c0_40, %c0_41], %42 {strides = array<i32>} : memref<2x22x650xf32, #tpu.memory_space<vmem>>, vector<1x22x650xf32>,
    %c1_42 = arith.constant 1 : index
    %c0_43 = arith.constant 0 : index
    %c0_44 = arith.constant 0 : index
    %43 = vector.load %arg1[%c1_42, %c0_43, %c0_44] : memref<2x8x756xf32, #tpu.memory_space<vmem>>, vector<1x8x702xf32>
    %44 = vector.shape_cast %43 : vector<1x8x702xf32> to vector<8x702xf32>
    %c1_45 = arith.constant 1 : index
    %c0_46 = arith.constant 0 : index
    %c1_47 = arith.constant 1 : index
    %45 = vector.load %arg1[%c1_45, %c0_46, %c1_47] : memref<2x8x756xf32, #tpu.memory_space<vmem>>, vector<1x8x702xf32>
    %46 = vector.shape_cast %45 : vector<1x8x702xf32> to vector<8x702xf32>
    %c1_48 = arith.constant 1 : index
    %c0_49 = arith.constant 0 : index
    %c2_50 = arith.constant 2 : index
    %47 = vector.load %arg1[%c1_48, %c0_49, %c2_50] : memref<2x8x756xf32, #tpu.memory_space<vmem>>, vector<1x8x702xf32>
    %48 = vector.shape_cast %47 : vector<1x8x702xf32> to vector<8x702xf32>
    %c1_51 = arith.constant 1 : index
    %c0_52 = arith.constant 0 : index
    %c26_53 = arith.constant 26 : index
    %49 = vector.load %arg1[%c1_51, %c0_52, %c26_53] : memref<2x8x756xf32, #tpu.memory_space<vmem>>, vector<1x8x702xf32>
    %50 = vector.shape_cast %49 : vector<1x8x702xf32> to vector<8x702xf32>
    %c1_54 = arith.constant 1 : index
    %c0_55 = arith.constant 0 : index
    %c27_56 = arith.constant 27 : index
    %51 = vector.load %arg1[%c1_54, %c0_55, %c27_56] : memref<2x8x756xf32, #tpu.memory_space<vmem>>, vector<1x8x702xf32>
    %52 = vector.shape_cast %51 : vector<1x8x702xf32> to vector<8x702xf32>
    %c1_57 = arith.constant 1 : index
    %c0_58 = arith.constant 0 : index
    %c28_59 = arith.constant 28 : index
    %53 = vector.load %arg1[%c1_57, %c0_58, %c28_59] : memref<2x8x756xf32, #tpu.memory_space<vmem>>, vector<1x8x702xf32>
    %54 = vector.shape_cast %53 : vector<1x8x702xf32> to vector<8x702xf32>
    %c1_60 = arith.constant 1 : index
    %c0_61 = arith.constant 0 : index
    %c52_62 = arith.constant 52 : index
    %55 = vector.load %arg1[%c1_60, %c0_61, %c52_62] : memref<2x8x756xf32, #tpu.memory_space<vmem>>, vector<1x8x702xf32>
    %56 = vector.shape_cast %55 : vector<1x8x702xf32> to vector<8x702xf32>
    %c1_63 = arith.constant 1 : index
    %c0_64 = arith.constant 0 : index
    %c53_65 = arith.constant 53 : index
    %57 = vector.load %arg1[%c1_63, %c0_64, %c53_65] : memref<2x8x756xf32, #tpu.memory_space<vmem>>, vector<1x8x702xf32>
    %58 = vector.shape_cast %57 : vector<1x8x702xf32> to vector<8x702xf32>
    %c1_66 = arith.constant 1 : index
    %c0_67 = arith.constant 0 : index
    %c54_68 = arith.constant 54 : index
    %59 = vector.load %arg1[%c1_66, %c0_67, %c54_68] : memref<2x8x756xf32, #tpu.memory_space<vmem>>, vector<1x8x702xf32>
    %60 = vector.shape_cast %59 : vector<1x8x702xf32> to vector<8x702xf32>
    %61 = tpu.concatenate %44, %46, %48, %50, %52, %54, %56, %58, %60 in 0 : vector<8x702xf32>, vector<8x702xf32>, vector<8x702xf32>, vector<8x702xf32>, vector<8x702xf32>, vector<8x702xf32>, vector<8x702xf32>, vector<8x702xf32>, vector<8x702xf32> -> vector<72x702xf32>
    %cst_69 = arith.constant dense<0.000000e+00> : vector<16x702xf32>
    %62 = tpu.matmul %0, %61, %cst_69 {dimension_numbers = #tpu.dot_dimension_numbers<[1], [0], [0], [1], [0, 0, 1, 1], [], []>} : vector<16x72xf32>, vector<72x702xf32>, vector<16x702xf32> -> vector<16x702xf32>
    %63 = vector.broadcast %1 : vector<16x1xf32> to vector<16x702xf32>
    %64 = arith.addf %62, %63 : vector<16x702xf32>
    %65 = math.tanh %64 : vector<16x702xf32>
    %66 = vector.broadcast %4 : vector<1x702xf32> to vector<16x702xf32>
    %67 = arith.mulf %65, %66 : vector<16x702xf32>
    %c0_70 = arith.constant 0 : index
    %c0_71 = arith.constant 0 : index
    %68 = vector.load %arg8[%c0_70, %c0_71] : memref<16x702xf32, #tpu.memory_space<vmem>>, vector<16x702xf32>
    tpu.vector_store %arg8[%c0_70, %c0_71], %67 {strides = array<i32>} : memref<16x702xf32, #tpu.memory_space<vmem>>, vector<16x702xf32>,
    %c0_72 = arith.constant 0 : index
    %c0_73 = arith.constant 0 : index
    %69 = vector.load %arg8[%c0_72, %c0_73] : memref<16x702xf32, #tpu.memory_space<vmem>>, vector<16x650xf32>
    %c0_74 = arith.constant 0 : index
    %c1_75 = arith.constant 1 : index
    %70 = vector.load %arg8[%c0_74, %c1_75] : memref<16x702xf32, #tpu.memory_space<vmem>>, vector<16x650xf32>
    %c0_76 = arith.constant 0 : index
    %c26_77 = arith.constant 26 : index
    %71 = vector.load %arg8[%c0_76, %c26_77] : memref<16x702xf32, #tpu.memory_space<vmem>>, vector<16x650xf32>
    %c0_78 = arith.constant 0 : index
    %c27_79 = arith.constant 27 : index
    %72 = vector.load %arg8[%c0_78, %c27_79] : memref<16x702xf32, #tpu.memory_space<vmem>>, vector<16x650xf32>
    %73 = tpu.concatenate %69, %70, %71, %72 in 0 : vector<16x650xf32>, vector<16x650xf32>, vector<16x650xf32>, vector<16x650xf32> -> vector<64x650xf32>
    %cst_80 = arith.constant dense<0.000000e+00> : vector<22x650xf32>
    %74 = tpu.matmul %2, %73, %cst_80 {dimension_numbers = #tpu.dot_dimension_numbers<[1], [0], [0], [1], [0, 0, 1, 1], [], []>} : vector<22x64xf32>, vector<64x650xf32>, vector<22x650xf32> -> vector<22x650xf32>
    %75 = vector.broadcast %3 : vector<22x1xf32> to vector<22x650xf32>
    %76 = arith.addf %74, %75 : vector<22x650xf32>
    %77 = math.tanh %76 : vector<22x650xf32>
    %c1_81 = arith.constant 1 : index
    %c0_82 = arith.constant 0 : index
    %c0_83 = arith.constant 0 : index
    %78 = vector.load %arg7[%c1_81, %c0_82, %c0_83] : memref<2x22x650xf32, #tpu.memory_space<vmem>>, vector<1x22x650xf32>
    %79 = vector.shape_cast %78 : vector<1x22x650xf32> to vector<22x650xf32>
    %80 = vector.shape_cast %77 : vector<22x650xf32> to vector<1x22x650xf32>
    tpu.vector_store %arg7[%c1_81, %c0_82, %c0_83], %80 {strides = array<i32>} : memref<2x22x650xf32, #tpu.memory_space<vmem>>, vector<1x22x650xf32>,
    return
  }
  func.func @transform_0(%arg0: i32) -> (i32, i32, i32) {
    %c0_i32 = arith.constant 0 : i32
    %c0_i32_0 = arith.constant 0 : i32
    %c0_i32_1 = arith.constant 0 : i32
    return %arg0, %c0_i32, %c0_i32_0 : i32, i32, i32
  }
  func.func @transform_1(%arg0: i32) -> (i32, i32) {
    %c0_i32 = arith.constant 0 : i32
    %c0_i32_0 = arith.constant 0 : i32
    %c0_i32_1 = arith.constant 0 : i32
    return %c0_i32, %c0_i32_0 : i32, i32
  }
  func.func @transform_2(%arg0: i32) -> (i32, i32) {
    %c0_i32 = arith.constant 0 : i32
    %c0_i32_0 = arith.constant 0 : i32
    %c0_i32_1 = arith.constant 0 : i32
    return %c0_i32, %c0_i32_0 : i32, i32
  }
  func.func @transform_3(%arg0: i32) -> (i32, i32) {
    %c0_i32 = arith.constant 0 : i32
    %c0_i32_0 = arith.constant 0 : i32
    %c0_i32_1 = arith.constant 0 : i32
    return %c0_i32, %c0_i32_0 : i32, i32
  }
  func.func @transform_4(%arg0: i32) -> (i32, i32) {
    %c0_i32 = arith.constant 0 : i32
    %c0_i32_0 = arith.constant 0 : i32
    %c0_i32_1 = arith.constant 0 : i32
    return %c0_i32, %c0_i32_0 : i32, i32
  }
  func.func @transform_5(%arg0: i32) -> (i32, i32) {
    %c0_i32 = arith.constant 0 : i32
    %c0_i32_0 = arith.constant 0 : i32
    %c0_i32_1 = arith.constant 0 : i32
    return %c0_i32, %c0_i32_0 : i32, i32
  }
  func.func @transform_6(%arg0: i32) -> (i32, i32, i32) {
    %c0_i32 = arith.constant 0 : i32
    %c0_i32_0 = arith.constant 0 : i32
    %c0_i32_1 = arith.constant 0 : i32
    return %arg0, %c0_i32, %c0_i32_0 : i32, i32, i32
  }
}

</mosaic_0001>

<bundles_post_ra>
// kernel: model_forward.1
= control target key start
LH: loop header
LB: loop body
LE: loop exit
PB: predicated region body
PF: predicated region fallthrough
CT: control target
= control target key end

     0   :  { %s2180_s25 = smov 76   ;;  %s2181_s26 = smov 75   ;;  %vm226_vm0 = vcmask 605184   ;;  %vm202_vm1 = vcmask 613376   ;;  %vm178_vm2 = vcmask 621568   ;;  %vm154_vm3 = vcmask 818176   ;;  %s3336_s0 = inlined_call_operand.vmem [shape: f32[2,8,756], index: 0, kind: input, shape index: {}]   ;;  %s3337_s2 = inlined_call_operand.vmem [shape: f32[16,72], index: 2, kind: input, shape index: {}]   ;;  %s3338_s3 = inlined_call_operand.vmem [shape: f32[16,1], index: 3, kind: input, shape index: {}]   ;;  %s3339_s1 = inlined_call_operand.vmem [shape: f32[1,702], index: 1, kind: input, shape index: {}]   ;;  %s3340_s4 = inlined_call_operand.vmem [shape: f32[22,64], index: 4, kind: input, shape index: {}]   ;;  %s3341_s5 = inlined_call_operand.vmem [shape: f32[22,1], index: 5, kind: input, shape index: {}]   ;;  %s3342_s6 = inlined_call_operand.vmem [shape: f32[2,22,650], index: 6, kind: output, shape index: {}]  }
   0x1   :  { %v2227_v0 = vld [vmem:[%s3336_s0] sm:$0xff]  ;;  %v2232_v1 = vld [vmem:[%s3336_s0 + $0x8] sm:$0xff]  ;;  %s2182_s27 = smov 74   ;;  %v2242_v3 = vld [vmem:[%s3336_s0 + $0x10] sm:$0xff]  ;;  %s2183_s8 = smov 101   ;;  %vm130_vm4 = vcmask 826368  }
   0x2   :  { %v1667_v2 = vpack.i.bf16 %v2232_v1, %v2227_v0  ;;  %v2247_v4 = vld [vmem:[%s3336_s0 + $0x18] sm:$0xff]  ;;  %s2184_s9 = smov 100   ;;  %s2185_s10 = smov 102   ;;  %v2268_v6 = vld [vmem:[%s3336_s0 + $0x20] sm:$0xff]  ;;  %v2273_v7 = vld [vmem:[%s3336_s0 + $0x28] sm:$0xff]  ;;  %vm106_vm5 = vcmask 834560  }
   0x3   :  { %v1672_v5 = vpack.i.bf16 %v2247_v4, %v2242_v3  ;;  %s2186_s11 = smov 127   ;;  %s2187_s12 = smov 126   ;;  %v1717_v8 = vpack.i.bf16 %v2273_v7, %v2268_v6  ;;  %v1742_v9 = vpack.i.bf16 %v2268_v6, %v2247_v4  ;;  %vm82_vm6 = vcmask 1031168  }
   0x4   :  { %1668 = vrot.lane.b32.xlu2 %v1667_v2, %s2180_s25  ;;  %1658 = vrot.lane.b32.xlu1 %v1667_v2, %s2181_s26  ;;  %vm58_vm7 = vcmask 1039360   ;;  %vm248_vm8 = vcmask 588800   ;;  %vm435_vm9 = vcmask 506880   ;;  %vm620_vm10 = vcmask 523264  }
   0x5   :  { %1648 = vrot.lane.b32.xlu0 %v1667_v2, %s2182_s27  ;;  %vm822_vm11 = vcmask 78848   ;;  %vm809_vm12 = vcmask 80896  }
   0xc   :  { %1673 = vrot.lane.b32.xlu2 %v1672_v5, %s2180_s25  ;;  %1663 = vrot.lane.b32.xlu1 %v1672_v5, %s2181_s26 }
   0xd   :  { %1653 = vrot.lane.b32.xlu0 %v1672_v5, %s2182_s27 }
  0x14   :  { %1688 = vrot.lane.b32.xlu2 %v1667_v2, %s2183_s8  ;;  %1683 = vrot.lane.b32.xlu1 %v1672_v5, %s2184_s9 }
  0x15   :  { %1678 = vrot.lane.b32.xlu0 %v1667_v2, %s2184_s9 }
  0x1c   :  { %98 = vrot.lane.b32.xlu2 %v2242_v3, %s2185_s10  ;;  %1698 = vrot.lane.b32.xlu1 %v1667_v2, %s2185_s10 }
  0x1d   :  { %1693 = vrot.lane.b32.xlu0 %v1672_v5, %s2183_s8 }
  0x24   :  { %1708 = vrot.lane.b32.xlu2 %v1667_v2, %s2186_s11  ;;  %74 = vrot.lane.b32.xlu1 %v2242_v3, %s2187_s12 }
  0x25   :  { %1703 = vrot.lane.b32.xlu0 %v1667_v2, %s2187_s12 }
  0x2c   :  { %1718 = vrot.lane.b32.xlu2 %v1717_v8, %s2181_s26  ;;  %1713 = vrot.lane.b32.xlu1 %v1717_v8, %s2182_s27 }
  0x2d   :  { %50 = vrot.lane.b32.xlu0 %v2242_v3, %s2186_s11 }
  0x34   :  { %1733 = vrot.lane.b32.xlu2 %v1717_v8, %s2183_s8  ;;  %1728 = vrot.lane.b32.xlu1 %v1717_v8, %s2184_s9 }
  0x35   :  { %1723 = vrot.lane.b32.xlu0 %v1717_v8, %s2180_s25 }
  0x3c   :  { %1743 = vrot.lane.b32.xlu2 %v1742_v9, %s2187_s12  ;;  %104 = vrot.lane.b32.xlu1 %v2273_v7, %s2185_s10 }
  0x3d   :  { %1738 = vrot.lane.b32.xlu0 %v1742_v9, %s2185_s10 }
  0x44   :  { %1748 = vrot.lane.b32.xlu1 %v1742_v9, %s2186_s11  ;;  %56 = vrot.lane.b32.xlu2 %v2273_v7, %s2186_s11 }
  0x45   :  { %80 = vrot.lane.b32.xlu0 %v2273_v7, %s2187_s12 }
  0x5e   :  { %v1669_v10 = vpop.permute.xlu2 %1668 }
  0x5f   :  { %v1671_v13 = vunpack.i.h.bf16 %v1669_v10  ;;  %v1670_v14 = vunpack.i.l.bf16 %v1669_v10 }
  0x61   :  { %v179_v23 = vsel %vm178_vm2, %v1670_v14, %v1671_v13 }
  0x66   :  { %v2295_v11 = vpop.permute.xlu2 %1673 }
  0x67   :  { %v1676_v25 = vunpack.i.h.bf16 %v2295_v11  ;;  %v1675_v31 = vunpack.i.l.bf16 %v2295_v11 }
  0x69   :  { %v181_v36 = vsel %vm178_vm2, %v1675_v31, %v1676_v25  ;;  %v180_v41 = vsel %vm178_vm2, %v1671_v13, %v1675_v31 }
  0x6e   :  { %v1689_v21 = vpop.permute.xlu2 %1688 }
  0x6f   :  { %v1691_v38 = vunpack.i.h.bf16 %v1689_v21  ;;  %v1690_v39 = vunpack.i.l.bf16 %v1689_v21 }
  0x71   :  { %v131_v50 = vsel %vm130_vm4, %v1690_v39, %v1691_v38 }
  0x76   :  { %v1659_v12 = vpop.permute.xlu1 %1658  ;;  %v2321_v37 = vpop.permute.xlu2 %98 }
  0x77   :  { %v1649_v15 = vpop.permute.xlu0 %1648  ;;  %v1661_v16 = vunpack.i.h.bf16 %v1659_v12  ;;  %v1660_v17 = vunpack.i.l.bf16 %v1659_v12 }
  0x78   :  { %v1651_v18 = vunpack.i.h.bf16 %v1649_v15  ;;  %v1650_v19 = vunpack.i.l.bf16 %v1649_v15  ;;  %v2354_v15 = vld [vmem:[%s3337_s2] sm:$0xff] }
  0x79   :  { %v203_v22 = vsel %vm202_vm1, %v1660_v17, %v1661_v16 }
  0x7a   :  { %v227_v20 = vsel %vm226_vm0, %v1650_v19, %v1651_v18 }
  0x7b   :  { %262 = vmatpush.msra.mxu0 %v227_v20 }
  0x7d   :  { %263 = vmatpush.msra.mxu0 %v203_v22  ;;  %v25_v22 = vld [vmem:[%s3338_s3] sm:$0xff] }
  0x7e   :  { %v2300_v24 = vpop.permute.xlu1 %1663  ;;  %v1709_v52 = vpop.permute.xlu2 %1708 }
  0x7f   :  { %v2303_v26 = vpop.permute.xlu0 %1653  ;;  %264 = vmatpush.msra.mxu0 %v179_v23  ;;  %v1666_v27 = vunpack.i.h.bf16 %v2300_v24  ;;  %v1665_v28 = vunpack.i.l.bf16 %v2300_v24  ;;  %v1711_v62 = vunpack.i.h.bf16 %v1709_v52  ;;  %v1710_v63 = vunpack.i.l.bf16 %v1709_v52  ;;  %v26_v24 = vld [vmem:[%s3338_s3 + $0x8] sm:$0xff] }
  0x80   :  { %v1656_v29 = vunpack.i.h.bf16 %v2303_v26  ;;  %v1655_v30 = vunpack.i.l.bf16 %v2303_v26  ;;  %v2380_v26 = vld [vmem:[%s3337_s2 + $0x8] sm:$0xff] }
  0x81   :  { %v204_v34 = vsel %vm202_vm1, %v1661_v16, %v1665_v28  ;;  %v205_v35 = vsel %vm202_vm1, %v1665_v28, %v1666_v27  ;;  %v59_v14 = vsel %vm58_vm7, %v1710_v63, %v1711_v62  ;;  %v2188_v28 = vmov 0  }
  0x82   :  { %v228_v32 = vsel %vm226_vm0, %v1651_v18, %v1655_v30  ;;  %v229_v33 = vsel %vm226_vm0, %v1655_v30, %v1656_v29  ;;  %1753 = vset.pattern.permute.xlu1 %v2188_v28  ;;  %1752 = vset.pattern.permute.xlu0 %v2188_v28 }
  0x83   :  { %285 = vmatpush.msra.mxu1 %v228_v32  ;;  %308 = vmatpush.msra.mxu2 %v229_v33 }
  0x84   :  { %240 = vperm.xlu1 %1753, %v25_v22   ;;  %2054 = vset.pattern.permute.xlu2 %v2188_v28 }
  0x85   :  { %286 = vmatpush.msra.mxu1 %v204_v34  ;;  %309 = vmatpush.msra.mxu2 %v205_v35 }
  0x86   :  { %v2323_v40 = vpop.permute.xlu1 %1683  ;;  %v1719_v10 = vpop.permute.xlu2 %1718  ;;  %245 = vperm.xlu0 %1752, %v26_v24  }
  0x87   :  { %v1686_v42 = vunpack.i.h.bf16 %v2323_v40  ;;  %v1685_v43 = vunpack.i.l.bf16 %v2323_v40  ;;  %v1679_v44 = vpop.permute.xlu0 %1678  ;;  %287 = vmatpush.msra.mxu1 %v180_v41  ;;  %310 = vmatpush.msra.mxu2 %v181_v36  ;;  %v1721_v17 = vunpack.i.h.bf16 %v1719_v10  ;;  %v1720_v18 = vunpack.i.l.bf16 %v1719_v10 }
  0x88   :  { %v1681_v45 = vunpack.i.h.bf16 %v1679_v44  ;;  %v1680_v46 = vunpack.i.l.bf16 %v1679_v44 }
  0x89   :  { %v157_v47 = vsel %vm154_vm3, %v1685_v43, %v1686_v42  ;;  %v206_v33 = vsel %vm202_vm1, %v1666_v27, %v1720_v18 }
  0x8a   :  { %v156_v48 = vsel %vm154_vm3, %v1681_v45, %v1685_v43  ;;  %311 = vmatpush.msra.mxu2 %v157_v47  ;;  %v155_v49 = vsel %vm154_vm3, %v1680_v46, %v1681_v45 }
  0x8b   :  { %288 = vmatpush.msra.mxu1 %v156_v48  ;;  %265 = vmatpush.msra.mxu0 %v155_v49 }
  0x8d   :  { %266 = vmatpush.msra.mxu0 %v131_v50 }
  0x8e   :  { %v1699_v51 = vpop.permute.xlu1 %1698  ;;  %v1734_v32 = vpop.permute.xlu2 %1733 }
  0x8f   :  { %v1701_v53 = vunpack.i.h.bf16 %v1699_v51  ;;  %v1700_v54 = vunpack.i.l.bf16 %v1699_v51  ;;  %v2334_v55 = vpop.permute.xlu0 %1693  ;;  %v1736_v43 = vunpack.i.h.bf16 %v1734_v32 }
  0x90   :  { %v1696_v56 = vunpack.i.h.bf16 %v2334_v55  ;;  %v1695_v57 = vunpack.i.l.bf16 %v2334_v55 }
  0x91   :  { %v107_v58 = vsel %vm106_vm5, %v1700_v54, %v1701_v53  ;;  %v108_v61 = vsel %vm106_vm5, %v1701_v53, %v2321_v37 }
  0x92   :  { %267 = vmatpush.msra.mxu0 %v107_v58  ;;  %v132_v59 = vsel %vm130_vm4, %v1691_v38, %v1695_v57  ;;  %v133_v60 = vsel %vm130_vm4, %v1695_v57, %v1696_v56  ;;  %v1735_v38 = vunpack.i.l.bf16 %v1734_v32 }
  0x93   :  { %289 = vmatpush.msra.mxu1 %v132_v59  ;;  %312 = vmatpush.msra.mxu2 %v133_v60 }
  0x94   :  { %v135_v46 = vsel %vm130_vm4, %v1735_v38, %v1736_v43 }
  0x95   :  { %290 = vmatpush.msra.mxu1 %v108_v61 }
  0x96   :  { %v2345_v2 = vpop.permute.xlu1 %74  ;;  %v1744_v47 = vpop.permute.xlu2 %1743 }
  0x97   :  { %v1704_v5 = vpop.permute.xlu0 %1703  ;;  %v1746_v48 = vunpack.i.h.bf16 %v1744_v47  ;;  %v1745_v40 = vunpack.i.l.bf16 %v1744_v47 }
  0x98   :  { %v1706_v8 = vunpack.i.h.bf16 %v1704_v5  ;;  %v1705_v9 = vunpack.i.l.bf16 %v1704_v5  ;;  %v2440_v5 = vld [vmem:[%s3339_s1] sm:$0x3f] }
  0x99   :  { %v86_v54 = vsel %vm82_vm6, %v1745_v40, %v1746_v48  ;;  %v85_v55 = vsel %vm82_vm6, %v2345_v2, %v1745_v40 }
  0x9a   :  { %v84_v12 = vsel %vm82_vm6, %v1706_v8, %v2345_v2  ;;  %v83_v13 = vsel %vm82_vm6, %v1705_v9, %v1706_v8  ;;  %v2443_v8 = vperm.slane %v2440_v5, 0 }
  0x9b   :  { %291 = vmatpush.msra.mxu1 %v84_v12  ;;  %268 = vmatpush.msra.mxu0 %v83_v13  ;;  %v2448_v13 = vperm.slane %v2440_v5, 1 }
  0x9d   :  { %269 = vmatpush.msra.mxu0 %v59_v14 }
  0x9e   :  { %v1714_v16 = vpop.permute.xlu1 %1713  ;;  %v57_v57 = vpop.permute.xlu2 %56 }
  0x9f   :  { %v1716_v19 = vunpack.i.h.bf16 %v1714_v16  ;;  %v1715_v20 = vunpack.i.l.bf16 %v1714_v16  ;;  %v2356_v21 = vpop.permute.xlu0 %50  ;;  %270 = vmatpush.msra.mxu0 %v2227_v0  ;;  %v207_v0 = vsel %vm202_vm1, %v1720_v18, %v1721_v17 }
  0xa0   :  { %v60_v23 = vsel %vm58_vm7, %v1711_v62, %v2356_v21  ;;  %1554 = vmatmul.msk.f32.vlgmr.msra.gmra.mxu0 %vm248_vm8, %v2354_v15 }
  0xa1   :  { %292 = vmatpush.msra.mxu1 %v60_v23  ;;  %v230_v30 = vsel %vm226_vm0, %v1656_v29, %v1715_v20  ;;  %v231_v31 = vsel %vm226_vm0, %v1715_v20, %v1716_v19 }
  0xa2   :  { %331 = vmatpush.msra.mxu3 %v230_v30  ;;  %354 = vmatpush.msrb.mxu0 %v231_v31 }
  0xa3   :  { %293 = vmatpush.msra.mxu1 %v2232_v1 }
  0xa4   :  { %332 = vmatpush.msra.mxu3 %v206_v33  ;;  %355 = vmatpush.msrb.mxu0 %v207_v0  ;;  %v2474_v33 = vperm.slane %v2440_v5, 5 }
  0xa5   :  { %377 = vmatpush.msrb.mxu1 %v1716_v19 }
  0xa6   :  { %1556 = vmatmul.msk.f32.vlgmr.msra.gmra.mxu1 %vm248_vm8, %v2354_v15  ;;  %v1729_v29 = vpop.permute.xlu1 %1728 }
  0xa7   :  { %378 = vmatpush.msrb.mxu1 %v1721_v17  ;;  %v1724_v1 = vpop.permute.xlu0 %1723  ;;  %v1730_v27 = vunpack.i.l.bf16 %v1729_v29  ;;  %v1731_v36 = vunpack.i.h.bf16 %v1729_v29 }
  0xa8   :  { %v1725_v34 = vunpack.i.l.bf16 %v1724_v1  ;;  %v1726_v35 = vunpack.i.h.bf16 %v1724_v1  ;;  %1555 = vmatmul.msk.f32.gmra.mxu0 %vm248_vm8, %v2380_v26 }
  0xa9   :  { %v158_v44 = vsel %vm154_vm3, %v1686_v42, %v1730_v27  ;;  %v159_v45 = vsel %vm154_vm3, %v1730_v27, %v1731_v36 }
  0xaa   :  { %379 = vmatpush.msrb.mxu1 %v1726_v35  ;;  %v182_v39 = vsel %vm178_vm2, %v1676_v25, %v1725_v34  ;;  %v183_v41 = vsel %vm178_vm2, %v1725_v34, %v1726_v35  ;;  %v134_v25 = vsel %vm130_vm4, %v1696_v56, %v1735_v38 }
  0xab   :  { %333 = vmatpush.msra.mxu3 %v182_v39  ;;  %356 = vmatpush.msrb.mxu0 %v183_v41  ;;  %v2482_v39 = vperm.slane %v2440_v5, 2  ;;  %v2485_v41 = vperm.slane %v2440_v5, 3 }
  0xac   :  { %380 = vmatpush.msrb.mxu1 %v1731_v36 }
  0xad   :  { %334 = vmatpush.msra.mxu3 %v158_v44  ;;  %357 = vmatpush.msrb.mxu0 %v159_v45 }
  0xae   :  { %381 = vmatpush.msrb.mxu1 %v1736_v43  ;;  %v105_v11 = vpop.permute.xlu1 %104 }
  0xaf   :  { %v1739_v49 = vpop.permute.xlu0 %1738  ;;  %335 = vmatpush.msra.mxu3 %v134_v25  ;;  %358 = vmatpush.msrb.mxu0 %v135_v46 }
  0xb0   :  { %v1741_v50 = vunpack.i.h.bf16 %v1739_v49  ;;  %v1740_v42 = vunpack.i.l.bf16 %v1739_v49  ;;  %382 = vmatpush.msrb.mxu1 %v105_v11 }
  0xb1   :  { %1557 = vmatmul.msk.f32.gmra.mxu1 %vm248_vm8, %v2380_v26 }
  0xb2   :  { %v109_v51 = vsel %vm106_vm5, %v2321_v37, %v1740_v42  ;;  %v111_v52 = vsel %vm106_vm5, %v1741_v50, %v105_v11  ;;  %v110_v53 = vsel %vm106_vm5, %v1740_v42, %v1741_v50 }
  0xb3   :  { %313 = vmatpush.msra.mxu2 %v109_v51  ;;  %359 = vmatpush.msrb.mxu0 %v111_v52 }
  0xb4   :  { %336 = vmatpush.msra.mxu3 %v110_v53 }
  0xb5   :  { %314 = vmatpush.msra.mxu2 %v85_v55 }
  0xb6   :  { %v1749_v56 = vpop.permute.xlu1 %1748  ;;  %337 = vmatpush.msra.mxu3 %v86_v54 }
  0xb7   :  { %v1751_v58 = vunpack.i.h.bf16 %v1749_v56  ;;  %v1750_v59 = vunpack.i.l.bf16 %v1749_v56  ;;  %v81_v60 = vpop.permute.xlu0 %80 }
  0xb8   :  { %383 = vmatpush.msrb.mxu1 %v81_v60  ;;  %v87_v37 = vsel %vm82_vm6, %v1746_v48, %v81_v60 }
  0xb9   :  { %360 = vmatpush.msrb.mxu0 %v87_v37  ;;  %v61_v61 = vsel %vm58_vm7, %v2356_v21, %v1750_v59  ;;  %v62_v62 = vsel %vm58_vm7, %v1750_v59, %v1751_v58  ;;  %v63_v63 = vsel %vm58_vm7, %v1751_v58, %v57_v57  ;;  %v2512_v59 = vperm.slane %v2440_v5, 4  ;;  %v2545_v5 = vld [vmem:[%s3336_s0 + $0x48] sm:$0xff] }
  0xba   :  { %384 = vmatpush.msrb.mxu1 %v57_v57  ;;  %315 = vmatpush.msra.mxu2 %v61_v61 }
  0xbb   :  { %338 = vmatpush.msra.mxu3 %v62_v62  ;;  %361 = vmatpush.msrb.mxu0 %v63_v63 }
  0xbc   :  { %385 = vmatpush.msrb.mxu1 %v2273_v7  ;;  %316 = vmatpush.msra.mxu2 %v2242_v3 }
  0xbd   :  { %339 = vmatpush.msra.mxu3 %v2247_v4  ;;  %362 = vmatpush.msrb.mxu0 %v2268_v6 }
  0xbe   :  { %1564 = vmatmul.msk.f32.vlgmr.msrb.gmra.mxu1 %vm248_vm8, %v2354_v15  ;;  %1558 = vmatmul.msk.f32.vlgmr.msra.gmra.mxu2 %vm248_vm8, %v2354_v15 }
  0xbf   :  { %1560 = vmatmul.msk.f32.vlgmr.msra.gmra.mxu3 %vm248_vm8, %v2354_v15  ;;  %1562 = vmatmul.msk.f32.vlgmr.msrb.gmra.mxu0 %vm248_vm8, %v2354_v15 }
  0xc6   :  { %1565 = vmatmul.msk.f32.gmra.mxu1 %vm248_vm8, %v2380_v26  ;;  %1559 = vmatmul.msk.f32.gmra.mxu2 %vm248_vm8, %v2380_v26 }
  0xc7   :  { %1561 = vmatmul.msk.f32.gmra.mxu3 %vm248_vm8, %v2380_v26  ;;  %1563 = vmatmul.msk.f32.gmra.mxu0 %vm248_vm8, %v2380_v26 }
  0xf6   :  { %v2433_v3 = vpop.permute.xlu1 %240 }
  0xf8   :  { %v2445_v9 = vpop.permute.xlu0 %245 }
 0x11d   :  { %v272_v4 = vpop.f32.mrf.mxu0 }
 0x11e   :  { %v273_v6 = vadd.f32 %v272_v4, %v2433_v3 }
 0x120   :  { %2055 = vtanh.f32 %v273_v6 }
 0x123   :  { %v295_v7 = vpop.f32.mrf.mxu1 }
 0x124   :  { %v296_v2 = vadd.f32 %v295_v7, %v2433_v3 }
 0x125   :  { %v275_v12 = vpop.f32.mrf.mxu0 }
 0x126   :  { %2057 = vtanh.f32 %v296_v2  ;;  %v2056_v10 = vpop.eup %2055  ;;  %v276_v14 = vadd.f32 %v275_v12, %v2445_v9  ;;  %v2540_v2 = vld [vmem:[%s3336_s0 + $0x40] sm:$0xff]  ;;  %v2558_v12 = vld [vmem:[%s3336_s0 + $0x30] sm:$0xff] }
 0x127   :  { %v2452_v16 = vmul.f32 %v2056_v10, %v2443_v8  ;;  %v1844_v10 = vpack.i.bf16 %v2545_v5, %v2540_v2 }
 0x128   :  { %2059 = vtanh.f32 %v276_v14  ;;  %v2563_v14 = vld [vmem:[%s3336_s0 + $0x38] sm:$0xff] }
 0x12c   :  { %v2058_v17 = vpop.eup %2057 }
 0x12d   :  { %v2455_v18 = vmul.f32 %v2058_v17, %v2448_v13  ;;  %v1874_v17 = vpack.i.bf16 %v2563_v14, %v2558_v12 }
 0x12e   :  { %v298_v19 = vpop.f32.mrf.mxu1  ;;  %v2060_v22 = vpop.eup %2059 }
 0x12f   :  { %v1754_v20 = vpack.i.bf16 %v2455_v18, %v2452_v16  ;;  %v299_v21 = vadd.f32 %v298_v19, %v2445_v9  ;;  %v2464_v23 = vmul.f32 %v2060_v22, %v2443_v8  ;;  %v2582_v19 = vld [vmem:[%s3336_s0 + $0x50] sm:$0xff] }
 0x131   :  { %1755 = vrot.lane.b32.xlu1 %v1754_v20, %s2183_s8  ;;  %1765 = vrot.lane.b32.xlu2 %v1754_v20, %s2186_s11  ;;  %2061 = vtanh.f32 %v299_v21 }
 0x132   :  { %1760 = vrot.lane.b32.xlu0 %v1754_v20, %s2185_s10  ;;  %v2587_v20 = vld [vmem:[%s3336_s0 + $0x58] sm:$0xff] }
 0x133   :  { %v1934_v21 = vpack.i.bf16 %v2587_v20, %v2582_v19 }
 0x137   :  { %v2062_v28 = vpop.eup %2061 }
 0x138   :  { %v2467_v30 = vmul.f32 %v2062_v28, %v2448_v13 }
 0x13a   :  { %v1794_v31 = vpack.i.bf16 %v2467_v30, %v2464_v23 }
 0x13b   :  { %v387_v0 = vpop.f32.mrf.mxu1 }
 0x13c   :  { %v388_v32 = vadd.f32 %v387_v0, %v2433_v3  ;;  %1795 = vrot.lane.b32.xlu1 %v1794_v31, %s2186_s11  ;;  %v364_v45 = vpop.f32.mrf.mxu0 }
 0x13d   :  { %v365_v51 = vadd.f32 %v364_v45, %v2433_v3 }
 0x13e   :  { %2063 = vtanh.f32 %v388_v32 }
 0x141   :  { %v318_v29 = vpop.f32.mrf.mxu2 }
 0x142   :  { %v319_v1 = vadd.f32 %v318_v29, %v2433_v3  ;;  %v341_v24 = vpop.f32.mrf.mxu3 }
 0x143   :  { %v342_v27 = vadd.f32 %v341_v24, %v2433_v3  ;;  %v390_v34 = vpop.f32.mrf.mxu1 }
 0x144   :  { %v2064_v35 = vpop.eup %2063  ;;  %2065 = vtanh.f32 %v319_v1  ;;  %v391_v36 = vadd.f32 %v390_v34, %v2445_v9  ;;  %v367_v55 = vpop.f32.mrf.mxu0 }
 0x145   :  { %v423_v38 = vmul.f32 %v2064_v35, %v2474_v33  ;;  %2067 = vtanh.f32 %v342_v27  ;;  %v368_v58 = vadd.f32 %v367_v55, %v2445_v9 }
 0x146   :  { %2069 = vtanh.f32 %v391_v36 }
 0x147   :  { %436 = vst.msk [vmem:[#allocation2 + $0x28] sm:$0xff] %vm435_vm9, %v423_v38 }
 0x149   :  { %v321_v43 = vpop.f32.mrf.mxu2 }
 0x14a   :  { %v2066_v44 = vpop.eup %2065  ;;  %v322_v46 = vadd.f32 %v321_v43, %v2445_v9  ;;  %v344_v47 = vpop.f32.mrf.mxu3 }
 0x14b   :  { %v2068_v11 = vpop.eup %2067  ;;  %v2489_v25 = vmul.f32 %v2066_v44, %v2482_v39  ;;  %v345_v48 = vadd.f32 %v344_v47, %v2445_v9 }
 0x14c   :  { %v2070_v49 = vpop.eup %2069  ;;  %v2493_v40 = vmul.f32 %v2068_v11, %v2485_v41  ;;  %2071 = vtanh.f32 %v322_v46 }
 0x14d   :  { %v429_v50 = vmul.f32 %v2070_v49, %v2474_v33  ;;  %2073 = vtanh.f32 %v345_v48 }
 0x14e   :  { %v1779_v42 = vpack.i.bf16 %v2493_v40, %v2489_v25  ;;  %2075 = vtanh.f32 %v365_v51  ;;  %v2517_v37 = vld [vmem:[#allocation2 + $0x28] sm:$0xff] }
 0x14f   :  { %442 = vst.msk [vmem:[#allocation2 + $0x58] sm:$0xff] %vm435_vm9, %v429_v50  ;;  %2077 = vtanh.f32 %v368_v58 }
 0x150   :  { %1780 = vrot.lane.b32.xlu2 %v1779_v42, %s2186_s11  ;;  %1770 = vrot.lane.b32.xlu0 %v1779_v42, %s2183_s8 }
 0x152   :  { %v2072_v52 = vpop.eup %2071 }
 0x153   :  { %v2074_v53 = vpop.eup %2073  ;;  %v2503_v54 = vmul.f32 %v2072_v52, %v2482_v39 }
 0x154   :  { %v2506_v56 = vmul.f32 %v2074_v53, %v2485_v41  ;;  %v2076_v60 = vpop.eup %2075 }
 0x155   :  { %v2520_v61 = vmul.f32 %v2076_v60, %v2512_v59  ;;  %v2078_v63 = vpop.eup %2077 }
 0x156   :  { %v1799_v57 = vpack.i.bf16 %v2506_v56, %v2503_v54  ;;  %v2527_v4 = vld [vmem:[#allocation2 + $0x58] sm:$0xff]  ;;  %v2530_v6 = vmul.f32 %v2078_v63, %v2512_v59 }
 0x157   :  { %v1819_v62 = vpack.i.bf16 %v2517_v37, %v2520_v61 }
 0x158   :  { %1785 = vrot.lane.b32.xlu2 %v1794_v31, %s2183_s8  ;;  %1775 = vrot.lane.b32.xlu0 %v1779_v42, %s2185_s10  ;;  %v1829_v7 = vpack.i.bf16 %v2527_v4, %v2530_v6 }
 0x159   :  { %1800 = vrot.lane.b32.xlu1 %v1799_v57, %s2183_s8 }
 0x160   :  { %1790 = vrot.lane.b32.xlu2 %v1794_v31, %s2185_s10  ;;  %1820 = vrot.lane.b32.xlu0 %v1819_v62, %s2185_s10 }
 0x161   :  { %1810 = vrot.lane.b32.xlu1 %v1799_v57, %s2186_s11 }
 0x168   :  { %1805 = vrot.lane.b32.xlu2 %v1799_v57, %s2185_s10  ;;  %1830 = vrot.lane.b32.xlu0 %v1829_v7, %s2183_s8  ;;  %v2628_v57 = vld [vmem:[%s3340_s4] sm:$0xff] }
 0x169   :  { %1815 = vrot.lane.b32.xlu1 %v1819_v62, %s2183_s8 }
 0x170   :  { %1845 = vrot.lane.b32.xlu2 %v1844_v10, %s2180_s25  ;;  %1835 = vrot.lane.b32.xlu0 %v1844_v10, %s2182_s27 }
 0x171   :  { %1825 = vrot.lane.b32.xlu1 %v1819_v62, %s2186_s11 }
 0x178   :  { %1860 = vrot.lane.b32.xlu2 %v1829_v7, %s2185_s10  ;;  %1850 = vrot.lane.b32.xlu0 %v1844_v10, %s2184_s9 }
 0x179   :  { %1840 = vrot.lane.b32.xlu1 %v1844_v10, %s2181_s26 }
 0x180   :  { %1865 = vrot.lane.b32.xlu2 %v1829_v7, %s2186_s11  ;;  %1875 = vrot.lane.b32.xlu0 %v1874_v17, %s2181_s26 }
 0x181   :  { %1855 = vrot.lane.b32.xlu1 %v1874_v17, %s2182_s27 }
 0x188   :  { %1870 = vrot.lane.b32.xlu2 %v1844_v10, %s2183_s8  ;;  %1890 = vrot.lane.b32.xlu0 %v1844_v10, %s2187_s12 }
 0x189   :  { %1880 = vrot.lane.b32.xlu1 %v1844_v10, %s2185_s10 }
 0x18b   :  { %v2593_v22 = vpop.permute.xlu2 %1765 }
 0x18c   :  { %v1768_v49 = vunpack.i.h.bf16 %v2593_v22  ;;  %v1767_v50 = vunpack.i.l.bf16 %v2593_v22 }
 0x18e   :  { %v491_v55 = vsel %vm58_vm7, %v1767_v50, %v1768_v49 }
 0x190   :  { %1885 = vrot.lane.b32.xlu2 %v1874_v17, %s2180_s25  ;;  %1905 = vrot.lane.b32.xlu0 %v1874_v17, %s2183_s8 }
 0x191   :  { %1895 = vrot.lane.b32.xlu1 %v1874_v17, %s2184_s9 }
 0x198   :  { %1900 = vrot.lane.b32.xlu2 %v1844_v10, %s2186_s11  ;;  %1920 = vrot.lane.b32.xlu0 %v1874_v17, %s2186_s11 }
 0x199   :  { %1910 = vrot.lane.b32.xlu1 %v1874_v17, %s2185_s10 }
 0x1a0   :  { %1915 = vrot.lane.b32.xlu2 %v1874_v17, %s2187_s12  ;;  %1935 = vrot.lane.b32.xlu0 %v1934_v21, %s2180_s25 }
 0x1a1   :  { %1925 = vrot.lane.b32.xlu1 %v1934_v21, %s2182_s27 }
 0x1a3   :  { %v1756_v31 = vpop.permute.xlu1 %1755 }
 0x1a4   :  { %v1758_v0 = vunpack.i.h.bf16 %v1756_v31  ;;  %v1757_v32 = vunpack.i.l.bf16 %v1756_v31  ;;  %v2605_v35 = vpop.permute.xlu0 %1760  ;;  %v2646_v31 = vld [vmem:[%s3340_s4 + $0x8] sm:$0xff] }
 0x1a5   :  { %v1763_v43 = vunpack.i.h.bf16 %v2605_v35  ;;  %v1762_v44 = vunpack.i.l.bf16 %v2605_v35 }
 0x1a6   :  { %v583_v34 = vsel %vm130_vm4, %v1757_v32, %v1758_v0 }
 0x1a7   :  { %v537_v42 = vsel %vm106_vm5, %v1762_v44, %v1763_v43 }
 0x1a8   :  { %1930 = vrot.lane.b32.xlu2 %v1934_v21, %s2181_s26  ;;  %1950 = vrot.lane.b32.xlu0 %v1934_v21, %s2185_s10 }
 0x1a9   :  { %1940 = vrot.lane.b32.xlu1 %v1934_v21, %s2184_s9 }
 0x1aa   :  { %v2599_v28 = vpop.permute.xlu2 %1780 }
 0x1ae   :  { %v2608_v36 = vpop.permute.xlu1 %1795 }
 0x1af   :  { %v1798_v47 = vunpack.i.h.bf16 %v2608_v36  ;;  %v1797_v11 = vunpack.i.l.bf16 %v2608_v36 }
 0x1b0   :  { %1945 = vrot.lane.b32.xlu2 %v1934_v21, %s2183_s8 }
 0x1b1   :  { %1955 = vrot.lane.b32.xlu1 %v1934_v21, %s2187_s12  ;;  %v496_v51 = vsel %vm58_vm7, %v1797_v11, %v1798_v47 }
 0x1b2   :  { %v1786_v29 = vpop.permute.xlu2 %1785 }
 0x1b3   :  { %v1788_v1 = vunpack.i.h.bf16 %v1786_v29  ;;  %v1787_v24 = vunpack.i.l.bf16 %v1786_v29 }
 0x1b5   :  { %v588_v27 = vsel %vm130_vm4, %v1787_v24, %v1788_v1 }
 0x1b6   :  { %638 = vmatpush.msrb.mxu2 %v588_v27 }
 0x1b8   :  { %1960 = vrot.lane.b32.xlu2 %v1934_v21, %s2186_s11  ;;  %639 = vmatpush.msrb.mxu2 %v583_v34 }
 0x1ba   :  { %v1791_v38 = vpop.permute.xlu2 %1790 }
 0x1bb   :  { %v1793_v45 = vunpack.i.h.bf16 %v1791_v38  ;;  %v1792_v46 = vunpack.i.l.bf16 %v1791_v38  ;;  %v1782_v38 = vunpack.i.l.bf16 %v2599_v28 }
 0x1bd   :  { %v542_v48 = vsel %vm106_vm5, %v1792_v46, %v1793_v45 }
 0x1be   :  { %640 = vmatpush.msrb.mxu2 %v542_v48 }
 0x1c0   :  { %641 = vmatpush.msrb.mxu2 %v537_v42 }
 0x1c2   :  { %v2619_v52 = vpop.permute.xlu2 %1805  ;;  %v2621_v53 = vpop.permute.xlu0 %1770  ;;  %642 = vmatpush.msrb.mxu2 %v496_v51  ;;  %v2677_v51 = vld [vmem:[%s3340_s4 + $0x10] sm:$0x3f] }
 0x1c3   :  { %v1773_v63 = vunpack.i.h.bf16 %v2621_v53  ;;  %v1808_v17 = vunpack.i.h.bf16 %v2619_v52  ;;  %v1807_v21 = vunpack.i.l.bf16 %v2619_v52 }
 0x1c4   :  { %643 = vmatpush.msrb.mxu2 %v491_v55  ;;  %v492_v55 = vsel %vm58_vm7, %v1768_v49, %v1782_v38 }
 0x1c5   :  { %v543_v35 = vsel %vm106_vm5, %v1793_v45, %v1807_v21  ;;  %v544_v36 = vsel %vm106_vm5, %v1807_v21, %v1808_v17 }
 0x1c6   :  { %644 = vmatpush.msrb.mxu2 %v2464_v23  ;;  %v1772_v23 = vunpack.i.l.bf16 %v2621_v53 }
 0x1c8   :  { %645 = vmatpush.msrb.mxu2 %v2452_v16  ;;  %v584_v24 = vsel %vm130_vm4, %v1758_v0, %v1772_v23  ;;  %v585_v27 = vsel %vm130_vm4, %v1772_v23, %v1773_v63  ;;  %v1783_v0 = vunpack.i.h.bf16 %v2599_v28 }
 0x1c9   :  { %1566 = vmatmul.msk.f32.vlgmr.msrb.gmra.mxu2 %vm620_vm10, %v2628_v57 }
 0x1ca   :  { %v2633_v58 = vpop.permute.xlu2 %1845  ;;  %v2635_v60 = vpop.permute.xlu0 %1775 }
 0x1cb   :  { %v1801_v62 = vpop.permute.xlu1 %1800  ;;  %v1778_v32 = vunpack.i.h.bf16 %v2635_v60  ;;  %v1777_v29 = vunpack.i.l.bf16 %v2635_v60 }
 0x1cc   :  { %v1803_v7 = vunpack.i.h.bf16 %v1801_v62  ;;  %v1802_v10 = vunpack.i.l.bf16 %v1801_v62 }
 0x1cd   :  { %v538_v45 = vsel %vm106_vm5, %v1763_v43, %v1777_v29  ;;  %v539_v48 = vsel %vm106_vm5, %v1777_v29, %v1778_v32  ;;  %v493_v43 = vsel %vm58_vm7, %v1782_v38, %v1783_v0 }
 0x1ce   :  { %v589_v16 = vsel %vm130_vm4, %v1788_v1, %v1802_v10  ;;  %v590_v22 = vsel %vm130_vm4, %v1802_v10, %v1803_v7 }
 0x1cf   :  { %664 = vmatpush.msrb.mxu3 %v589_v16  ;;  %690 = vmatpush.msra.mxu0 %v590_v22 }
 0x1d1   :  { %665 = vmatpush.msrb.mxu3 %v584_v24  ;;  %691 = vmatpush.msra.mxu0 %v585_v27 }
 0x1d2   :  { %v1861_v1 = vpop.permute.xlu2 %1860  ;;  %v2654_v34 = vpop.permute.xlu0 %1820  ;;  %1567 = vmatmul.msk.f32.gmra.mxu2 %vm620_vm10, %v2646_v31 }
 0x1d3   :  { %v2664_v44 = vpop.permute.xlu1 %1810  ;;  %666 = vmatpush.msrb.mxu3 %v543_v35  ;;  %692 = vmatpush.msra.mxu0 %v544_v36  ;;  %v1862_v22 = vunpack.i.l.bf16 %v1861_v1  ;;  %v1863_v27 = vunpack.i.h.bf16 %v1861_v1  ;;  %v1822_v35 = vunpack.i.l.bf16 %v2654_v34 }
 0x1d4   :  { %v1813_v46 = vunpack.i.h.bf16 %v2664_v44  ;;  %v1812_v11 = vunpack.i.l.bf16 %v2664_v44 }
 0x1d5   :  { %667 = vmatpush.msrb.mxu3 %v538_v45  ;;  %693 = vmatpush.msra.mxu0 %v539_v48  ;;  %v546_v1 = vsel %vm106_vm5, %v1862_v22, %v1863_v27  ;;  %v540_v36 = vsel %vm106_vm5, %v1778_v32, %v1822_v35 }
 0x1d6   :  { %v497_v50 = vsel %vm58_vm7, %v1798_v47, %v1812_v11  ;;  %v498_v42 = vsel %vm58_vm7, %v1812_v11, %v1813_v46 }
 0x1d7   :  { %668 = vmatpush.msrb.mxu3 %v497_v50  ;;  %694 = vmatpush.msra.mxu0 %v498_v42 }
 0x1d9   :  { %669 = vmatpush.msrb.mxu3 %v492_v55  ;;  %695 = vmatpush.msra.mxu0 %v493_v43  ;;  %v1848_v55 = vunpack.i.h.bf16 %v2633_v58 }
 0x1da   :  { %v1831_v62 = vpop.permute.xlu0 %1830  ;;  %1568 = vmatmul.msk.f32.gmra.mxu2 %vm620_vm10, %v2677_v51  ;;  %v1866_v47 = vpop.permute.xlu2 %1865 }
 0x1db   :  { %v1833_v23 = vunpack.i.h.bf16 %v1831_v62  ;;  %v1832_v10 = vunpack.i.l.bf16 %v1831_v62  ;;  %v1816_v21 = vpop.permute.xlu1 %1815  ;;  %670 = vmatpush.msrb.mxu3 %v2467_v30  ;;  %696 = vmatpush.msra.mxu0 %v2503_v54  ;;  %v1867_v54 = vunpack.i.l.bf16 %v1866_v47  ;;  %v1868_v53 = vunpack.i.h.bf16 %v1866_v47 }
 0x1dc   :  { %v1818_v16 = vunpack.i.h.bf16 %v1816_v21  ;;  %v1817_v49 = vunpack.i.l.bf16 %v1816_v21 }
 0x1dd   :  { %671 = vmatpush.msrb.mxu3 %v2455_v18  ;;  %697 = vmatpush.msra.mxu0 %v2489_v25  ;;  %v591_v29 = vsel %vm130_vm4, %v1803_v7, %v1832_v10  ;;  %v592_v24 = vsel %vm130_vm4, %v1832_v10, %v1833_v23  ;;  %v1823_v18 = vunpack.i.h.bf16 %v2654_v34  ;;  %v545_v7 = vsel %vm106_vm5, %v1808_v17, %v1862_v22 }
 0x1de   :  { %716 = vmatpush.msra.mxu1 %v591_v29  ;;  %742 = vmatpush.msra.mxu2 %v592_v24  ;;  %v586_v30 = vsel %vm130_vm4, %v1773_v63, %v1817_v49  ;;  %v587_v25 = vsel %vm130_vm4, %v1817_v49, %v1818_v16  ;;  %v499_v11 = vsel %vm58_vm7, %v1813_v46, %v1867_v54 }
 0x1df   :  { %768 = vmatpush.msra.mxu3 %v1833_v23  ;;  %1572 = vmatmul.msk.f32.vlgmr.msra.gmra.mxu0 %vm620_vm10, %v2628_v57  ;;  %v541_v17 = vsel %vm106_vm5, %v1822_v35, %v1823_v18  ;;  %v500_v45 = vsel %vm58_vm7, %v1867_v54, %v1868_v53 }
 0x1e0   :  { %1569 = vmatmul.msk.f32.vlgmr.msrb.gmra.mxu3 %vm620_vm10, %v2628_v57  ;;  %717 = vmatpush.msra.mxu1 %v586_v30 }
 0x1e1   :  { %769 = vmatpush.msra.mxu3 %v1818_v16  ;;  %743 = vmatpush.msra.mxu2 %v587_v25 }
 0x1e2   :  { %v2704_v63 = vpop.permute.xlu0 %1835  ;;  %718 = vmatpush.msra.mxu1 %v545_v7  ;;  %v2711_v44 = vpop.permute.xlu2 %1870 }
 0x1e3   :  { %770 = vmatpush.msra.mxu3 %v1863_v27  ;;  %v1826_v34 = vpop.permute.xlu1 %1825  ;;  %744 = vmatpush.msra.mxu2 %v546_v1  ;;  %v1838_v32 = vunpack.i.h.bf16 %v2704_v63  ;;  %v1837_v48 = vunpack.i.l.bf16 %v2704_v63  ;;  %v1872_v62 = vunpack.i.l.bf16 %v2711_v44 }
 0x1e4   :  { %v1828_v38 = vunpack.i.h.bf16 %v1826_v34  ;;  %v1827_v52 = vunpack.i.l.bf16 %v1826_v34  ;;  %719 = vmatpush.msra.mxu1 %v540_v36 }
 0x1e5   :  { %771 = vmatpush.msra.mxu3 %v1823_v18  ;;  %745 = vmatpush.msra.mxu2 %v541_v17 }
 0x1e6   :  { %720 = vmatpush.msra.mxu1 %v499_v11  ;;  %v494_v60 = vsel %vm58_vm7, %v1783_v0, %v1827_v52  ;;  %v495_v46 = vsel %vm58_vm7, %v1827_v52, %v1828_v38 }
 0x1e7   :  { %772 = vmatpush.msra.mxu3 %v1868_v53  ;;  %746 = vmatpush.msra.mxu2 %v500_v45 }
 0x1e8   :  { %1570 = vmatmul.msk.f32.gmra.mxu3 %vm620_vm10, %v2646_v31  ;;  %721 = vmatpush.msra.mxu1 %v494_v60 }
 0x1e9   :  { %773 = vmatpush.msra.mxu3 %v1828_v38  ;;  %747 = vmatpush.msra.mxu2 %v495_v46 }
 0x1ea   :  { %1573 = vmatmul.msk.f32.gmra.mxu0 %vm620_vm10, %v2646_v31  ;;  %v2726_v28 = vpop.permute.xlu0 %1850  ;;  %722 = vmatpush.msra.mxu1 %v2506_v56  ;;  %v1847_v56 = vunpack.i.l.bf16 %v2633_v58 }
 0x1eb   :  { %774 = vmatpush.msra.mxu3 %v2527_v4  ;;  %v2729_v0 = vpop.permute.xlu1 %1840  ;;  %748 = vmatpush.msra.mxu2 %v2530_v6  ;;  %v1012_v4 = vsel %vm226_vm0, %v1837_v48, %v1838_v32  ;;  %v1853_v6 = vunpack.i.h.bf16 %v2726_v28  ;;  %v1852_v43 = vunpack.i.l.bf16 %v2726_v28 }
 0x1ec   :  { %v1843_v50 = vunpack.i.h.bf16 %v2729_v0  ;;  %v1842_v42 = vunpack.i.l.bf16 %v2729_v0  ;;  %723 = vmatpush.msra.mxu1 %v2493_v40  ;;  %v966_v47 = vsel %vm178_vm2, %v1847_v56, %v1848_v55 }
 0x1ed   :  { %775 = vmatpush.msra.mxu3 %v2517_v37  ;;  %749 = vmatpush.msra.mxu2 %v2520_v61  ;;  %v1886_v37 = vpop.permute.xlu2 %1885  ;;  %v1873_v61 = vunpack.i.h.bf16 %v2711_v44  ;;  %v943_v10 = vsel %vm154_vm3, %v1852_v43, %v1853_v6 }
 0x1ee   :  { %1575 = vmatmul.msk.f32.vlgmr.msra.gmra.mxu1 %vm620_vm10, %v2628_v57  ;;  %1578 = vmatmul.msk.f32.vlgmr.msra.gmra.mxu2 %vm620_vm10, %v2628_v57  ;;  %v989_v40 = vsel %vm202_vm1, %v1842_v42, %v1843_v50  ;;  %v1887_v49 = vunpack.i.l.bf16 %v1886_v37  ;;  %v1888_v35 = vunpack.i.h.bf16 %v1886_v37 }
 0x1ef   :  { %1074 = vmatpush.msrb.mxu2 %v1012_v4  ;;  %v920_v27 = vsel %vm130_vm4, %v1872_v62, %v1873_v61 }
 0x1f0   :  { %1571 = vmatmul.msk.f32.gmra.mxu3 %vm620_vm10, %v2677_v51  ;;  %v964_v7 = vsel %vm178_vm2, %v1887_v49, %v1888_v35  ;;  %v965_v34 = vsel %vm178_vm2, %v1888_v35, %v1847_v56 }
 0x1f1   :  { %1075 = vmatpush.msrb.mxu2 %v989_v40 }
 0x1f2   :  { %1574 = vmatmul.msk.f32.gmra.mxu0 %vm620_vm10, %v2677_v51  ;;  %v1876_v23 = vpop.permute.xlu0 %1875 }
 0x1f3   :  { %1076 = vmatpush.msrb.mxu2 %v966_v47  ;;  %v1877_v21 = vunpack.i.l.bf16 %v1876_v23  ;;  %v1856_v16 = vpop.permute.xlu1 %1855  ;;  %v1878_v22 = vunpack.i.h.bf16 %v1876_v23 }
 0x1f4   :  { %v1858_v29 = vunpack.i.h.bf16 %v1856_v16  ;;  %v1857_v24 = vunpack.i.l.bf16 %v1856_v16 }
 0x1f5   :  { %1077 = vmatpush.msrb.mxu2 %v943_v10  ;;  %v987_v25 = vsel %vm202_vm1, %v1877_v21, %v1878_v22  ;;  %v988_v54 = vsel %vm202_vm1, %v1878_v22, %v1842_v42  ;;  %v2781_v53 = vpop.permute.xlu2 %1900 }
 0x1f6   :  { %1576 = vmatmul.msk.f32.gmra.mxu1 %vm620_vm10, %v2646_v31  ;;  %1579 = vmatmul.msk.f32.gmra.mxu2 %vm620_vm10, %v2646_v31  ;;  %v1010_v30 = vsel %vm226_vm0, %v1857_v24, %v1858_v29  ;;  %v1011_v18 = vsel %vm226_vm0, %v1858_v29, %v1837_v48  ;;  %v1903_v17 = vunpack.i.h.bf16 %v2781_v53  ;;  %v1902_v11 = vunpack.i.l.bf16 %v2781_v53 }
 0x1f7   :  { %1028 = vmatpush.msrb.mxu0 %v1010_v30  ;;  %1051 = vmatpush.msrb.mxu1 %v1011_v18 }
 0x1f8   :  { %1078 = vmatpush.msrb.mxu2 %v920_v27  ;;  %1581 = vmatmul.msk.f32.vlgmr.msra.gmra.mxu3 %vm620_vm10, %v2628_v57  ;;  %v851_v42 = vsel %vm58_vm7, %v1902_v11, %v1903_v17 }
 0x1f9   :  { %1052 = vmatpush.msrb.mxu1 %v988_v54  ;;  %1029 = vmatpush.msrb.mxu0 %v987_v25 }
 0x1fa   :  { %v2783_v1 = vpop.permute.xlu0 %1890 }
 0x1fb   :  { %v1893_v36 = vunpack.i.h.bf16 %v2783_v1  ;;  %v1892_v38 = vunpack.i.l.bf16 %v2783_v1  ;;  %v2788_v52 = vpop.permute.xlu1 %1880  ;;  %1053 = vmatpush.msrb.mxu1 %v965_v34  ;;  %1030 = vmatpush.msrb.mxu0 %v964_v7 }
 0x1fc   :  { %v1883_v45 = vunpack.i.h.bf16 %v2788_v52  ;;  %v1882_v60 = vunpack.i.l.bf16 %v2788_v52 }
 0x1fd   :  { %v874_v46 = vsel %vm82_vm6, %v1892_v38, %v1893_v36  ;;  %v1916_v56 = vpop.permute.xlu2 %1915 }
 0x1fe   :  { %1577 = vmatmul.msk.f32.gmra.mxu1 %vm620_vm10, %v2677_v51  ;;  %1580 = vmatmul.msk.f32.gmra.mxu2 %vm620_vm10, %v2677_v51  ;;  %v897_v48 = vsel %vm106_vm5, %v1882_v60, %v1883_v45  ;;  %v1918_v29 = vunpack.i.h.bf16 %v1916_v56 }
 0x1ff   :  { %1079 = vmatpush.msrb.mxu2 %v897_v48 }
 0x200   :  { %1582 = vmatmul.msk.f32.gmra.mxu3 %vm620_vm10, %v2646_v31  ;;  %v873_v25 = vsel %vm82_vm6, %v1918_v29, %v1892_v38 }
 0x201   :  { %1080 = vmatpush.msrb.mxu2 %v874_v46 }
 0x202   :  { %v1906_v4 = vpop.permute.xlu0 %1905 }
 0x203   :  { %v1907_v40 = vunpack.i.l.bf16 %v1906_v4  ;;  %v1896_v37 = vpop.permute.xlu1 %1895  ;;  %1081 = vmatpush.msrb.mxu2 %v851_v42  ;;  %v1908_v47 = vunpack.i.h.bf16 %v1906_v4 }
 0x204   :  { %v1898_v23 = vunpack.i.h.bf16 %v1896_v37  ;;  %v1897_v10 = vunpack.i.l.bf16 %v1896_v37 }
 0x205   :  { %1082 = vmatpush.msrb.mxu2 %v2540_v2  ;;  %v918_v16 = vsel %vm130_vm4, %v1907_v40, %v1908_v47  ;;  %v919_v49 = vsel %vm130_vm4, %v1908_v47, %v1872_v62  ;;  %v1931_v35 = vpop.permute.xlu2 %1930 }
 0x206   :  { %1594 = vmatmul.msk.f32.vlgmr.msrb.gmra.mxu2 %vm248_vm8, %v2354_v15  ;;  %v941_v21 = vsel %vm154_vm3, %v1897_v10, %v1898_v23  ;;  %v942_v31 = vsel %vm154_vm3, %v1898_v23, %v1852_v43  ;;  %v1917_v15 = vunpack.i.l.bf16 %v1916_v56  ;;  %v1933_v48 = vunpack.i.h.bf16 %v1931_v35  ;;  %v2835_v56 = vld [vmem:[%s3337_s2] sm:$0xff] }
 0x207   :  { %1031 = vmatpush.msrb.mxu0 %v941_v21  ;;  %1054 = vmatpush.msrb.mxu1 %v942_v31 }
 0x208   :  { %1583 = vmatmul.msk.f32.gmra.mxu3 %vm620_vm10, %v2677_v51  ;;  %v872_v51 = vsel %vm82_vm6, %v1917_v15, %v1918_v29 }
 0x209   :  { %1055 = vmatpush.msrb.mxu1 %v919_v49  ;;  %1032 = vmatpush.msrb.mxu0 %v918_v16  ;;  %v2176_v49 = vld [vmem:[%s3337_s2 + $0x8] sm:$0xff] }
 0x20a   :  { %v1921_v2 = vpop.permute.xlu0 %1920 }
 0x20b   :  { %v1911_v22 = vpop.permute.xlu1 %1910  ;;  %v1922_v24 = vunpack.i.l.bf16 %v1921_v2  ;;  %v1923_v30 = vunpack.i.h.bf16 %v1921_v2 }
 0x20c   :  { %v1913_v27 = vunpack.i.h.bf16 %v1911_v22  ;;  %v1912_v43 = vunpack.i.l.bf16 %v1911_v22 }
 0x20d   :  { %v849_v54 = vsel %vm58_vm7, %v1922_v24, %v1923_v30  ;;  %v850_v34 = vsel %vm58_vm7, %v1923_v30, %v1902_v11  ;;  %v1946_v40 = vpop.permute.xlu2 %1945 }
 0x20e   :  { %1595 = vmatmul.msk.f32.gmra.mxu2 %vm248_vm8, %v2380_v26  ;;  %v895_v18 = vsel %vm106_vm5, %v1912_v43, %v1913_v27  ;;  %v896_v62 = vsel %vm106_vm5, %v1913_v27, %v1882_v60  ;;  %v1932_v26 = vunpack.i.l.bf16 %v1931_v35  ;;  %v1947_v21 = vunpack.i.l.bf16 %v1946_v40 }
 0x20f   :  { %1033 = vmatpush.msrb.mxu0 %v895_v18  ;;  %1056 = vmatpush.msrb.mxu1 %v896_v62 }
 0x210   :  { %v990_v37 = vsel %vm202_vm1, %v1843_v50, %v1932_v26  ;;  %v921_v2 = vsel %vm130_vm4, %v1873_v61, %v1947_v21 }
 0x211   :  { %1034 = vmatpush.msrb.mxu0 %v872_v51  ;;  %1057 = vmatpush.msrb.mxu1 %v873_v25 }
 0x212   :  { %v1936_v7 = vpop.permute.xlu0 %1935 }
 0x213   :  { %v1926_v46 = vpop.permute.xlu1 %1925  ;;  %1035 = vmatpush.msrb.mxu0 %v849_v54  ;;  %1058 = vmatpush.msrb.mxu1 %v850_v34  ;;  %v1938_v4 = vunpack.i.h.bf16 %v1936_v7  ;;  %v1937_v38 = vunpack.i.l.bf16 %v1936_v7 }
 0x214   :  { %v1928_v42 = vunpack.i.h.bf16 %v1926_v46  ;;  %v1927_v60 = vunpack.i.l.bf16 %v1926_v46 }
 0x215   :  { %1036 = vmatpush.msrb.mxu0 %v2558_v12  ;;  %1059 = vmatpush.msrb.mxu1 %v2563_v14  ;;  %v991_v14 = vsel %vm202_vm1, %v1932_v26, %v1933_v48  ;;  %v968_v47 = vsel %vm178_vm2, %v1937_v38, %v1938_v4  ;;  %v967_v63 = vsel %vm178_vm2, %v1848_v55, %v1937_v38  ;;  %v1961_v22 = vpop.permute.xlu2 %1960 }
 0x216   :  { %1590 = vmatmul.msk.f32.vlgmr.msrb.gmra.mxu0 %vm248_vm8, %v2835_v56  ;;  %1592 = vmatmul.msk.f32.vlgmr.msrb.gmra.mxu1 %vm248_vm8, %v2835_v56  ;;  %v1013_v11 = vsel %vm226_vm0, %v1838_v32, %v1927_v60  ;;  %v1014_v12 = vsel %vm226_vm0, %v1927_v60, %v1928_v42  ;;  %v1948_v32 = vunpack.i.h.bf16 %v1946_v40  ;;  %v1963_v24 = vunpack.i.h.bf16 %v1961_v22 }
 0x217   :  { %1097 = vmatpush.msrb.mxu3 %v1013_v11  ;;  %1143 = vmatpush.msra.mxu1 %v1928_v42  ;;  %v1962_v27 = vunpack.i.l.bf16 %v1961_v22 }
 0x218   :  { %1120 = vmatpush.msra.mxu0 %v1014_v12  ;;  %v922_v15 = vsel %vm130_vm4, %v1947_v21, %v1948_v32 }
 0x219   :  { %1098 = vmatpush.msrb.mxu3 %v990_v37  ;;  %1144 = vmatpush.msra.mxu1 %v1933_v48  ;;  %v853_v30 = vsel %vm58_vm7, %v1962_v27, %v1963_v24  ;;  %v852_v52 = vsel %vm58_vm7, %v1903_v17, %v1962_v27 }
 0x21a   :  { %1121 = vmatpush.msra.mxu0 %v991_v14  ;;  %v1951_v23 = vpop.permute.xlu0 %1950 }
 0x21b   :  { %v1941_v10 = vpop.permute.xlu1 %1940  ;;  %1099 = vmatpush.msrb.mxu3 %v967_v63  ;;  %1145 = vmatpush.msra.mxu1 %v1938_v4  ;;  %v1953_v50 = vunpack.i.h.bf16 %v1951_v23  ;;  %v1952_v16 = vunpack.i.l.bf16 %v1951_v23 }
 0x21c   :  { %v1943_v31 = vunpack.i.h.bf16 %v1941_v10  ;;  %v1942_v0 = vunpack.i.l.bf16 %v1941_v10  ;;  %1122 = vmatpush.msra.mxu0 %v968_v47 }
 0x21d   :  { %v899_v29 = vsel %vm106_vm5, %v1952_v16, %v1953_v50  ;;  %v898_v28 = vsel %vm106_vm5, %v1883_v45, %v1952_v16 }
 0x21e   :  { %1591 = vmatmul.msk.f32.gmra.mxu0 %vm248_vm8, %v2176_v49  ;;  %1593 = vmatmul.msk.f32.gmra.mxu1 %vm248_vm8, %v2176_v49  ;;  %v944_v58 = vsel %vm154_vm3, %v1853_v6, %v1942_v0  ;;  %v945_v55 = vsel %vm154_vm3, %v1942_v0, %v1943_v31 }
 0x21f   :  { %1100 = vmatpush.msrb.mxu3 %v944_v58  ;;  %1146 = vmatpush.msra.mxu1 %v1943_v31 }
 0x220   :  { %1123 = vmatpush.msra.mxu0 %v945_v55 }
 0x221   :  { %1101 = vmatpush.msrb.mxu3 %v921_v2  ;;  %1147 = vmatpush.msra.mxu1 %v1948_v32 }
 0x222   :  { %1124 = vmatpush.msra.mxu0 %v922_v15 }
 0x223   :  { %v1956_v6 = vpop.permute.xlu1 %1955  ;;  %1102 = vmatpush.msrb.mxu3 %v898_v28  ;;  %1148 = vmatpush.msra.mxu1 %v1953_v50 }
 0x224   :  { %v1958_v43 = vunpack.i.h.bf16 %v1956_v6  ;;  %v1957_v44 = vunpack.i.l.bf16 %v1956_v6  ;;  %1125 = vmatpush.msra.mxu0 %v899_v29 }
 0x226   :  { %1149 = vmatpush.msra.mxu1 %v1958_v43  ;;  %v875_v61 = vsel %vm82_vm6, %v1893_v36, %v1957_v44  ;;  %v876_v35 = vsel %vm82_vm6, %v1957_v44, %v1958_v43 }
 0x227   :  { %1103 = vmatpush.msrb.mxu3 %v875_v61  ;;  %1126 = vmatpush.msra.mxu0 %v876_v35 }
 0x228   :  { %1150 = vmatpush.msra.mxu1 %v1963_v24 }
 0x229   :  { %1104 = vmatpush.msrb.mxu3 %v852_v52  ;;  %1127 = vmatpush.msra.mxu0 %v853_v30 }
 0x22a   :  { %1151 = vmatpush.msra.mxu1 %v2587_v20 }
 0x22b   :  { %1105 = vmatpush.msrb.mxu3 %v2545_v5  ;;  %1128 = vmatpush.msra.mxu0 %v2582_v19 }
 0x22c   :  { %1600 = vmatmul.msk.f32.vlgmr.msra.gmra.mxu1 %vm248_vm8, %v2835_v56  ;;  %1596 = vmatmul.msk.f32.vlgmr.msrb.gmra.mxu3 %vm248_vm8, %v2835_v56 }
 0x22d   :  { %1598 = vmatmul.msk.f32.vlgmr.msra.gmra.mxu0 %vm248_vm8, %v2835_v56 }
 0x234   :  { %1601 = vmatmul.msk.f32.gmra.mxu1 %vm248_vm8, %v2176_v49  ;;  %1597 = vmatmul.msk.f32.gmra.mxu3 %vm248_vm8, %v2176_v49 }
 0x235   :  { %1599 = vmatmul.msk.f32.gmra.mxu0 %vm248_vm8, %v2176_v49 }
 0x24c   :  { %v2890_v20 = vpop.f32.mrf.mxu2 }
 0x255   :  { %v2892_v5 = vpop.f32.mrf.mxu2 }
 0x25c   :  { %v2900_v36 = vpop.f32.mrf.mxu0 }
 0x25d   :  { %v2894_v19 = vpop.f32.mrf.mxu2 }
 0x263   :  { %v2898_v1 = vpop.f32.mrf.mxu3 }
 0x267   :  { %v2908_v62 = vpop.f32.mrf.mxu0 }
 0x26b   :  { %v2902_v17 = vpop.f32.mrf.mxu1  ;;  %v2906_v18 = vpop.f32.mrf.mxu3 }
 0x26f   :  { %v2916_v7 = vpop.f32.mrf.mxu0 }
 0x271   :  { %v2896_v53 = vpop.f32.mrf.mxu2 }
 0x273   :  { %v2910_v51 = vpop.f32.mrf.mxu1  ;;  %v2914_v54 = vpop.f32.mrf.mxu3 }
 0x279   :  { %v2904_v45 = vpop.f32.mrf.mxu2 }
 0x27b   :  { %v2918_v48 = vpop.f32.mrf.mxu1  ;;  %v2921_v26 = vpop.f32.mrf.mxu3 }
 0x281   :  { %v2912_v25 = vpop.f32.mrf.mxu2 }
 0x283   :  { %v2929_v37 = vpop.f32.mrf.mxu3 }
 0x289   :  { %v1084_v34 = vpop.f32.mrf.mxu2 }
 0x28a   :  { %v1085_v46 = vadd.f32 %v1084_v34, %v2433_v3 }
 0x28b   :  { %v2951_v15 = vpop.f32.mrf.mxu3 }
 0x28c   :  { %2079 = vtanh.f32 %v1085_v46 }
 0x291   :  { %v1087_v42 = vpop.f32.mrf.mxu2 }
 0x292   :  { %v2080_v60 = vpop.eup %2079  ;;  %v1088_v4 = vadd.f32 %v1087_v42, %v2445_v9 }
 0x293   :  { %v2925_v38 = vmul.f32 %v2080_v60, %v2482_v39  ;;  %v1038_v56 = vpop.f32.mrf.mxu0  ;;  %v1061_v11 = vpop.f32.mrf.mxu1 }
 0x294   :  { %2081 = vtanh.f32 %v1088_v4  ;;  %v1039_v12 = vadd.f32 %v1038_v56, %v2433_v3  ;;  %v1062_v40 = vadd.f32 %v1061_v11, %v2433_v3 }
 0x296   :  { %2083 = vtanh.f32 %v1039_v12 }
 0x297   :  { %2085 = vtanh.f32 %v1062_v40 }
 0x29a   :  { %v2082_v14 = vpop.eup %2081 }
 0x29b   :  { %v2932_v47 = vmul.f32 %v2082_v14, %v2482_v39  ;;  %v1041_v63 = vpop.f32.mrf.mxu0  ;;  %v1064_v32 = vpop.f32.mrf.mxu1 }
 0x29c   :  { %v2084_v23 = vpop.eup %2083  ;;  %v1042_v10 = vadd.f32 %v1041_v63, %v2445_v9  ;;  %v1065_v21 = vadd.f32 %v1064_v32, %v2445_v9 }
 0x29d   :  { %v2086_v31 = vpop.eup %2085  ;;  %v2937_v0 = vmul.f32 %v2084_v23, %v2443_v8  ;;  %v32_v23 = vld [vmem:[%s3341_s5 + $0x10] sm:$0x3f] }
 0x29e   :  { %v2940_v50 = vmul.f32 %v2086_v31, %v2448_v13  ;;  %2087 = vtanh.f32 %v1042_v10  ;;  %v30_v10 = vld [vmem:[%s3341_s5] sm:$0xff] }
 0x29f   :  { %2089 = vtanh.f32 %v1065_v21  ;;  %v1989_v39 = vpack.i.bf16 %v2937_v0, %v2932_v47 }
 0x2a0   :  { %v1979_v16 = vpack.i.bf16 %v2925_v38, %v2940_v50 }
 0x2a1   :  { %1990 = vrot.lane.b32.xlu1 %v1989_v39, %s2183_s8 }
 0x2a2   :  { %1980 = vrot.lane.b32.xlu2 %v1979_v16, %s2183_s8 }
 0x2a4   :  { %v2088_v49 = vpop.eup %2087 }
 0x2a5   :  { %v2090_v58 = vpop.eup %2089  ;;  %v2949_v55 = vmul.f32 %v2088_v49, %v2443_v8 }
 0x2a6   :  { %v2954_v2 = vmul.f32 %v2090_v58, %v2448_v13 }
 0x2a8   :  { %v1964_v22 = vpack.i.bf16 %v2954_v2, %v2949_v55 }
 0x2a9   :  { %v1153_v29 = vpop.f32.mrf.mxu1  ;;  %1995 = vrot.lane.b32.xlu1 %v1989_v39, %s2185_s10 }
 0x2aa   :  { %v1154_v24 = vadd.f32 %v1153_v29, %v2433_v3  ;;  %v1130_v28 = vpop.f32.mrf.mxu0  ;;  %1965 = vrot.lane.b32.xlu0 %v1964_v22, %s2183_s8  ;;  %1985 = vrot.lane.b32.xlu2 %v1979_v16, %s2185_s10 }
 0x2ab   :  { %v1131_v8 = vadd.f32 %v1130_v28, %v2433_v3 }
 0x2ac   :  { %2091 = vtanh.f32 %v1154_v24 }
 0x2ad   :  { %2093 = vtanh.f32 %v1131_v8 }
 0x2af   :  { %v1107_v6 = vpop.f32.mrf.mxu3 }
 0x2b0   :  { %v1108_v13 = vadd.f32 %v1107_v6, %v2433_v3 }
 0x2b1   :  { %v1156_v27 = vpop.f32.mrf.mxu1  ;;  %2000 = vrot.lane.b32.xlu1 %v1989_v39, %s2186_s11 }
 0x2b2   :  { %v2092_v43 = vpop.eup %2091  ;;  %2095 = vtanh.f32 %v1108_v13  ;;  %v1157_v44 = vadd.f32 %v1156_v27, %v2445_v9  ;;  %v1133_v61 = vpop.f32.mrf.mxu0  ;;  %1970 = vrot.lane.b32.xlu0 %v1964_v22, %s2185_s10  ;;  %2005 = vrot.lane.b32.xlu2 %v1979_v16, %s2186_s11 }
 0x2b3   :  { %v2094_v35 = vpop.eup %2093  ;;  %v1176_v30 = vmul.f32 %v2092_v43, %v2474_v33  ;;  %v1134_v52 = vadd.f32 %v1133_v61, %v2445_v9 }
 0x2b4   :  { %v2971_v34 = vmul.f32 %v2094_v35, %v2512_v59  ;;  %2097 = vtanh.f32 %v1157_v44 }
 0x2b5   :  { %1188 = vst.msk [vmem:[#allocation2 + $0x28] sm:$0xff] %vm435_vm9, %v1176_v30  ;;  %2099 = vtanh.f32 %v1134_v52 }
 0x2b7   :  { %v1110_v3 = vpop.f32.mrf.mxu3 }
 0x2b8   :  { %v2096_v46 = vpop.eup %2095  ;;  %v1111_v42 = vadd.f32 %v1110_v3, %v2445_v9 }
 0x2b9   :  { %v2976_v60 = vmul.f32 %v2096_v46, %v2485_v41 }
 0x2ba   :  { %v2098_v4 = vpop.eup %2097  ;;  %2101 = vtanh.f32 %v1111_v42  ;;  %1975 = vrot.lane.b32.xlu0 %v1964_v22, %s2186_s11 }
 0x2bb   :  { %v2100_v56 = vpop.eup %2099  ;;  %v1182_v11 = vmul.f32 %v2098_v4, %v2474_v33 }
 0x2bc   :  { %v2981_v12 = vmul.f32 %v2100_v56, %v2512_v59  ;;  %v2983_v40 = vld [vmem:[#allocation2 + $0x28] sm:$0xff] }
 0x2bd   :  { %1194 = vst.msk [vmem:[#allocation2 + $0x58] sm:$0xff] %vm435_vm9, %v1182_v11  ;;  %v2009_v9 = vpack.i.bf16 %v2983_v40, %v2971_v34 }
 0x2bf   :  { %2010 = vrot.lane.b32.xlu1 %v2009_v9, %s2183_s8 }
 0x2c0   :  { %v2102_v14 = vpop.eup %2101 }
 0x2c1   :  { %v2990_v63 = vmul.f32 %v2102_v14, %v2485_v41  ;;  %v31_v41 = vld [vmem:[%s3341_s5 + $0x8] sm:$0xff] }
 0x2c3   :  { %v2039_v33 = vpack.i.bf16 %v2976_v60, %v2990_v63 }
 0x2c4   :  { %v2992_v32 = vld [vmem:[#allocation2 + $0x58] sm:$0xff] }
 0x2c5   :  { %v2029_v59 = vpack.i.bf16 %v2992_v32, %v2981_v12 }
 0x2c7   :  { %2030 = vrot.lane.b32.xlu2 %v2029_v59, %s2185_s10  ;;  %2015 = vrot.lane.b32.xlu0 %v2029_v59, %s2183_s8 }
 0x2c8   :  { %2040 = vrot.lane.b32.xlu1 %v2039_v33, %s2183_s8 }
 0x2cf   :  { %2035 = vrot.lane.b32.xlu2 %v2029_v59, %s2186_s11  ;;  %2020 = vrot.lane.b32.xlu0 %v2009_v9, %s2185_s10 }
 0x2d0   :  { %2045 = vrot.lane.b32.xlu1 %v2039_v33, %s2185_s10 }
 0x2d7   :  { %2050 = vrot.lane.b32.xlu2 %v2039_v33, %s2186_s11  ;;  %2025 = vrot.lane.b32.xlu0 %v2009_v9, %s2186_s11 }
 0x2d8   :  { %612 = vperm.xlu1 %1753, %v31_v41  }
 0x2df   :  { %617 = vperm.xlu2 %2054, %v32_v23   ;;  %607 = vperm.xlu0 %1752, %v30_v10  }
 0x2fc   :  { %v3015_v21 = vpop.permute.xlu2 %1980 }
 0x2fd   :  { %v1983_v49 = vunpack.i.h.bf16 %v3015_v21  ;;  %v1982_v58 = vunpack.i.l.bf16 %v3015_v21 }
 0x2ff   :  { %v1336_v61 = vsel %vm130_vm4, %v1982_v58, %v1983_v49 }
 0x304   :  { %v3017_v31 = vpop.permute.xlu2 %1985 }
 0x305   :  { %v1988_v35 = vunpack.i.h.bf16 %v3017_v31  ;;  %v1987_v30 = vunpack.i.l.bf16 %v3017_v31 }
 0x307   :  { %v1290_v59 = vsel %vm106_vm5, %v1987_v30, %v1988_v35 }
 0x30c   :  { %v3021_v16 = vpop.permute.xlu2 %2005 }
 0x30d   :  { %v2008_v41 = vunpack.i.h.bf16 %v3021_v16  ;;  %v2007_v23 = vunpack.i.l.bf16 %v3021_v16 }
 0x313   :  { %v3019_v39 = vpop.permute.xlu1 %1990 }
 0x314   :  { %v1993_v29 = vunpack.i.h.bf16 %v3019_v39  ;;  %v1992_v24 = vunpack.i.l.bf16 %v3019_v39 }
 0x316   :  { %v1335_v44 = vsel %vm130_vm4, %v1993_v29, %v1982_v58 }
 0x31b   :  { %v3027_v6 = vpop.permute.xlu1 %1995 }
 0x31c   :  { %v1966_v22 = vpop.permute.xlu0 %1965  ;;  %v1998_v3 = vunpack.i.h.bf16 %v3027_v6  ;;  %v1997_v46 = vunpack.i.l.bf16 %v3027_v6 }
 0x31d   :  { %v1968_v28 = vunpack.i.h.bf16 %v1966_v22  ;;  %v1967_v8 = vunpack.i.l.bf16 %v1966_v22 }
 0x31e   :  { %v1289_v33 = vsel %vm106_vm5, %v1998_v3, %v1987_v30  ;;  %v1244_v30 = vsel %vm58_vm7, %v2007_v23, %v2008_v41 }
 0x31f   :  { %v1340_v13 = vsel %vm130_vm4, %v1967_v8, %v1968_v28  ;;  %v1341_v27 = vsel %vm130_vm4, %v1968_v28, %v1992_v24 }
 0x320   :  { %1365 = vmatpush.msra.mxu2 %v1340_v13  ;;  %1391 = vmatpush.msra.mxu3 %v1341_v27 }
 0x321   :  { %v3033_v43 = vpop.permute.xlu2 %2030 }
 0x322   :  { %1366 = vmatpush.msra.mxu2 %v1335_v44  ;;  %1392 = vmatpush.msra.mxu3 %v1336_v61 }
 0x323   :  { %v3049_v14 = vpop.permute.xlu1 %2000 }
 0x324   :  { %v1971_v52 = vpop.permute.xlu0 %1970  ;;  %v2003_v58 = vunpack.i.h.bf16 %v3049_v14  ;;  %v2002_v22 = vunpack.i.l.bf16 %v3049_v14 }
 0x325   :  { %v1973_v42 = vunpack.i.h.bf16 %v1971_v52  ;;  %v1972_v4 = vunpack.i.l.bf16 %v1971_v52  ;;  %v2033_v52 = vunpack.i.h.bf16 %v3033_v43 }
 0x326   :  { %v1243_v61 = vsel %vm58_vm7, %v2003_v58, %v2007_v23 }
 0x327   :  { %v1294_v56 = vsel %vm106_vm5, %v1972_v4, %v1973_v42  ;;  %v1295_v11 = vsel %vm106_vm5, %v1973_v42, %v1997_v46 }
 0x328   :  { %1367 = vmatpush.msra.mxu2 %v1294_v56  ;;  %1393 = vmatpush.msra.mxu3 %v1295_v11 }
 0x329   :  { %v3047_v9 = vpop.permute.xlu2 %2035 }
 0x32a   :  { %1368 = vmatpush.msra.mxu2 %v1289_v33  ;;  %1394 = vmatpush.msra.mxu3 %v1290_v59 }
 0x32c   :  { %v1976_v10 = vpop.permute.xlu0 %1975 }
 0x32d   :  { %v1978_v29 = vunpack.i.h.bf16 %v1976_v10  ;;  %v1977_v28 = vunpack.i.l.bf16 %v1976_v10 }
 0x32f   :  { %v1248_v8 = vsel %vm58_vm7, %v1977_v28, %v1978_v29  ;;  %v1249_v13 = vsel %vm58_vm7, %v1978_v29, %v2002_v22  ;;  %v2038_v28 = vunpack.i.h.bf16 %v3047_v9 }
 0x330   :  { %1369 = vmatpush.msra.mxu2 %v1248_v8  ;;  %1395 = vmatpush.msra.mxu3 %v1249_v13  ;;  %v2037_v8 = vunpack.i.l.bf16 %v3047_v9 }
 0x331   :  { %v3063_v27 = vpop.permute.xlu2 %2050  ;;  %v2011_v44 = vpop.permute.xlu1 %2010 }
 0x332   :  { %1370 = vmatpush.msra.mxu2 %v1243_v61  ;;  %1396 = vmatpush.msra.mxu3 %v1244_v30  ;;  %v2013_v4 = vunpack.i.h.bf16 %v2011_v44  ;;  %v2012_v56 = vunpack.i.l.bf16 %v2011_v44 }
 0x334   :  { %1371 = vmatpush.msra.mxu2 %v2949_v55  ;;  %1397 = vmatpush.msra.mxu3 %v2954_v2  ;;  %v1339_v58 = vsel %vm130_vm4, %v2012_v56, %v2013_v4 }
 0x336   :  { %1372 = vmatpush.msra.mxu2 %v2937_v0  ;;  %1398 = vmatpush.msra.mxu3 %v2940_v50 }
 0x337   :  { %1602 = vmatmul.msk.f32.vlgmr.msra.gmra.mxu2 %vm620_vm10, %v2628_v57  ;;  %1605 = vmatmul.msk.f32.vlgmr.msra.gmra.mxu3 %vm620_vm10, %v2628_v57 }
 0x339   :  { %v3078_v3 = vpop.permute.xlu2 %617  ;;  %v2016_v42 = vpop.permute.xlu0 %2015 }
 0x33a   :  { %v654_v55 = vadd.f32 %v2894_v19, %v3078_v3  ;;  %v680_v0 = vadd.f32 %v2914_v54, %v3078_v3  ;;  %v706_v50 = vadd.f32 %v2916_v7, %v3078_v3  ;;  %v2041_v2 = vpop.permute.xlu1 %2040  ;;  %v732_v57 = vadd.f32 %v2918_v48, %v3078_v3 }
 0x33b   :  { %v2018_v11 = vunpack.i.h.bf16 %v2016_v42  ;;  %v2017_v33 = vunpack.i.l.bf16 %v2016_v42  ;;  %v758_v59 = vadd.f32 %v2912_v25, %v3078_v3  ;;  %v2043_v23 = vunpack.i.h.bf16 %v2041_v2 }
 0x33c   :  { %2103 = vtanh.f32 %v654_v55  ;;  %v2042_v10 = vunpack.i.l.bf16 %v2041_v2  ;;  %v2032_v19 = vunpack.i.l.bf16 %v3033_v43  ;;  %v784_v54 = vadd.f32 %v2951_v15, %v3078_v3 }
 0x33d   :  { %2105 = vtanh.f32 %v680_v0  ;;  %1495 = vmatpush.msrb.mxu3 %v2018_v11  ;;  %v1344_v7 = vsel %vm130_vm4, %v2017_v33, %v2018_v11  ;;  %v1337_v15 = vsel %vm130_vm4, %v1983_v49, %v2043_v23  ;;  %v3112_v49 = vld [vmem:[%s3340_s4 + $0x8] sm:$0xff]  ;;  %v2052_v55 = vunpack.i.l.bf16 %v3063_v27 }
 0x33e   :  { %2107 = vtanh.f32 %v706_v50  ;;  %1469 = vmatpush.msrb.mxu2 %v1344_v7  ;;  %v1342_v48 = vsel %vm130_vm4, %v1992_v24, %v2042_v10  ;;  %v1343_v25 = vsel %vm130_vm4, %v2042_v10, %v2017_v33  ;;  %v1298_v39 = vsel %vm106_vm5, %v2032_v19, %v2033_v52 }
 0x33f   :  { %2109 = vtanh.f32 %v732_v57  ;;  %1496 = vmatpush.msrb.mxu3 %v2013_v4  ;;  %1417 = vmatpush.msrb.mxu0 %v1342_v48  ;;  %v1338_v24 = vsel %vm130_vm4, %v2043_v23, %v2012_v56  ;;  %v1252_v56 = vsel %vm58_vm7, %v2037_v8, %v2038_v28 }
 0x340   :  { %2111 = vtanh.f32 %v758_v59  ;;  %1470 = vmatpush.msrb.mxu2 %v1339_v58  ;;  %1443 = vmatpush.msrb.mxu1 %v1343_v25  ;;  %v1250_v59 = vsel %vm58_vm7, %v2002_v22, %v2052_v55 }
 0x341   :  { %2113 = vtanh.f32 %v784_v54  ;;  %1497 = vmatpush.msrb.mxu3 %v2033_v52  ;;  %v2021_v43 = vpop.permute.xlu0 %2020  ;;  %1418 = vmatpush.msrb.mxu0 %v1337_v15 }
 0x342   :  { %v2104_v29 = vpop.eup %2103  ;;  %v2023_v13 = vunpack.i.h.bf16 %v2021_v43  ;;  %v2022_v44 = vunpack.i.l.bf16 %v2021_v43  ;;  %1471 = vmatpush.msrb.mxu2 %v1298_v39  ;;  %1444 = vmatpush.msrb.mxu1 %v1338_v24  ;;  %v2046_v21 = vpop.permute.xlu1 %2045 }
 0x343   :  { %v2106_v61 = vpop.eup %2105  ;;  %817 = vst [vmem:[%s3342_s6 + $0x60] sm:$0x3f] %v2104_v29  ;;  %1603 = vmatmul.msk.f32.gmra.mxu2 %vm620_vm10, %v3112_v49  ;;  %1606 = vmatmul.msk.f32.gmra.mxu3 %vm620_vm10, %v3112_v49  ;;  %v2048_v9 = vunpack.i.h.bf16 %v2046_v21  ;;  %v2047_v30 = vunpack.i.l.bf16 %v2046_v21 }
 0x344   :  { %v2108_v52 = vpop.eup %2107  ;;  %818 = vst [vmem:[%s3342_s6 + $0x68] sm:$0x3f] %v2106_v61  ;;  %1498 = vmatpush.msrb.mxu3 %v2023_v13  ;;  %v1293_v42 = vsel %vm106_vm5, %v2022_v44, %v2023_v13 }
 0x345   :  { %v2110_v4 = vpop.eup %2109  ;;  %819 = vst [vmem:[%s3342_s6 + $0x70] sm:$0x3f] %v2108_v52  ;;  %1472 = vmatpush.msrb.mxu2 %v1293_v42  ;;  %v1296_v0 = vsel %vm106_vm5, %v1997_v46, %v2047_v30  ;;  %v1297_v50 = vsel %vm106_vm5, %v2047_v30, %v2032_v19  ;;  %v1291_v6 = vsel %vm106_vm5, %v1988_v35, %v2048_v9  ;;  %v2053_v46 = vunpack.i.h.bf16 %v3063_v27  ;;  %v3155_v27 = vld [vmem:[%s3340_s4 + $0x10] sm:$0x3f] }
 0x346   :  { %v2112_v2 = vpop.eup %2111  ;;  %820 = vst [vmem:[%s3342_s6 + $0x78] sm:$0x3f] %v2110_v4  ;;  %1499 = vmatpush.msrb.mxu3 %v2038_v28  ;;  %1419 = vmatpush.msrb.mxu0 %v1296_v0  ;;  %v1292_v11 = vsel %vm106_vm5, %v2048_v9, %v2022_v44  ;;  %v1251_v35 = vsel %vm58_vm7, %v2052_v55, %v2037_v8 }
 0x347   :  { %v2114_v57 = vpop.eup %2113  ;;  %821 = vst [vmem:[%s3342_s6 + $0x80] sm:$0x3f] %v2112_v2  ;;  %1473 = vmatpush.msrb.mxu2 %v1252_v56  ;;  %1445 = vmatpush.msrb.mxu1 %v1297_v50  ;;  %v1245_v7 = vsel %vm58_vm7, %v2008_v41, %v2053_v46 }
 0x348   :  { %1420 = vmatpush.msrb.mxu0 %v1291_v6  ;;  %823 = vst.msk [vmem:[%s3342_s6 + $0x88] sm:$0x3f] %vm822_vm11, %v2114_v57 }
 0x349   :  { %v2026_v33 = vpop.permute.xlu0 %2025  ;;  %1446 = vmatpush.msrb.mxu1 %v1292_v11 }
 0x34a   :  { %v2028_v23 = vunpack.i.h.bf16 %v2026_v33  ;;  %v2027_v31 = vunpack.i.l.bf16 %v2026_v33  ;;  %v3149_v10 = vpop.permute.xlu1 %612  ;;  %1421 = vmatpush.msrb.mxu0 %v1250_v59 }
 0x34b   :  { %1604 = vmatmul.msk.f32.gmra.mxu2 %vm620_vm10, %v3155_v27  ;;  %1607 = vmatmul.msk.f32.gmra.mxu3 %vm620_vm10, %v3155_v27  ;;  %v651_v14 = vadd.f32 %v2892_v5, %v3149_v10  ;;  %v677_v22 = vadd.f32 %v2906_v18, %v3149_v10  ;;  %v703_v19 = vadd.f32 %v2908_v62, %v3149_v10 }
 0x34c   :  { %1500 = vmatpush.msrb.mxu3 %v2028_v23  ;;  %v729_v54 = vadd.f32 %v2910_v51, %v3149_v10  ;;  %1447 = vmatpush.msrb.mxu1 %v1251_v35  ;;  %v755_v48 = vadd.f32 %v2904_v45, %v3149_v10  ;;  %v1247_v5 = vsel %vm58_vm7, %v2027_v31, %v2028_v23 }
 0x34d   :  { %2115 = vtanh.f32 %v651_v14  ;;  %1422 = vmatpush.msrb.mxu0 %v1245_v7  ;;  %v1246_v18 = vsel %vm58_vm7, %v2053_v46, %v2027_v31  ;;  %v781_v62 = vadd.f32 %v2929_v37, %v3149_v10  ;;  %1474 = vmatpush.msrb.mxu2 %v1247_v5 }
 0x34e   :  { %2117 = vtanh.f32 %v677_v22  ;;  %1501 = vmatpush.msrb.mxu3 %v2992_v32  ;;  %1448 = vmatpush.msrb.mxu1 %v1246_v18 }
 0x34f   :  { %2119 = vtanh.f32 %v703_v19  ;;  %1423 = vmatpush.msrb.mxu0 %v2932_v47  ;;  %1475 = vmatpush.msrb.mxu2 %v2981_v12  ;;  %v2179_v12 = vld [vmem:[%s3340_s4] sm:$0xff] }
 0x350   :  { %2121 = vtanh.f32 %v729_v54  ;;  %1502 = vmatpush.msrb.mxu3 %v2983_v40  ;;  %1449 = vmatpush.msrb.mxu1 %v2990_v63 }
 0x351   :  { %2123 = vtanh.f32 %v755_v48  ;;  %v3182_v45 = vpop.permute.xlu0 %607  ;;  %1424 = vmatpush.msrb.mxu0 %v2925_v38  ;;  %1476 = vmatpush.msrb.mxu2 %v2971_v34 }
 0x352   :  { %2125 = vtanh.f32 %v781_v62  ;;  %v648_v51 = vadd.f32 %v2890_v20, %v3182_v45  ;;  %v674_v37 = vadd.f32 %v2898_v1, %v3182_v45  ;;  %v700_v47 = vadd.f32 %v2900_v36, %v3182_v45  ;;  %1608 = vmatmul.msk.f32.vlgmr.msrb.gmra.mxu0 %vm620_vm10, %v2179_v12  ;;  %1450 = vmatpush.msrb.mxu1 %v2976_v60 }
 0x353   :  { %v2116_v40 = vpop.eup %2115  ;;  %v726_v38 = vadd.f32 %v2902_v17, %v3182_v45  ;;  %1614 = vmatmul.msk.f32.vlgmr.msrb.gmra.mxu2 %vm620_vm10, %v2179_v12  ;;  %v752_v1 = vadd.f32 %v2896_v53, %v3182_v45  ;;  %1611 = vmatmul.msk.f32.vlgmr.msrb.gmra.mxu1 %vm620_vm10, %v2179_v12  ;;  %v778_v17 = vadd.f32 %v2921_v26, %v3182_v45 }
 0x354   :  { %v2118_v20 = vpop.eup %2117  ;;  %811 = vst [vmem:[%s3342_s6 + $0x30] sm:$0xff] %v2116_v40  ;;  %2127 = vtanh.f32 %v648_v51  ;;  %1617 = vmatmul.msk.f32.vlgmr.msrb.gmra.mxu3 %vm620_vm10, %v2179_v12 }
 0x355   :  { %v2120_v36 = vpop.eup %2119  ;;  %812 = vst [vmem:[%s3342_s6 + $0x38] sm:$0xff] %v2118_v20  ;;  %2129 = vtanh.f32 %v674_v37 }
 0x356   :  { %v2122_v34 = vpop.eup %2121  ;;  %813 = vst [vmem:[%s3342_s6 + $0x40] sm:$0xff] %v2120_v36  ;;  %2131 = vtanh.f32 %v700_v47 }
 0x357   :  { %v2124_v53 = vpop.eup %2123  ;;  %814 = vst [vmem:[%s3342_s6 + $0x48] sm:$0xff] %v2122_v34  ;;  %2133 = vtanh.f32 %v726_v38 }
 0x358   :  { %v2126_v60 = vpop.eup %2125  ;;  %815 = vst [vmem:[%s3342_s6 + $0x50] sm:$0xff] %v2124_v53  ;;  %2135 = vtanh.f32 %v752_v1 }
 0x359   :  { %2137 = vtanh.f32 %v778_v17  ;;  %816 = vst.msk [vmem:[%s3342_s6 + $0x58] sm:$0xff] %vm809_vm12, %v2126_v60 }
 0x35a   :  { %v2128_v26 = vpop.eup %2127  ;;  %1609 = vmatmul.msk.f32.gmra.mxu0 %vm620_vm10, %v3112_v49 }
 0x35b   :  { %v2130_v63 = vpop.eup %2129  ;;  %804 = vst [vmem:[%s3342_s6] sm:$0xff] %v2128_v26  ;;  %1615 = vmatmul.msk.f32.gmra.mxu2 %vm620_vm10, %v3112_v49  ;;  %1612 = vmatmul.msk.f32.gmra.mxu1 %vm620_vm10, %v3112_v49 }
 0x35c   :  { %v2132_v32 = vpop.eup %2131  ;;  %805 = vst [vmem:[%s3342_s6 + $0x8] sm:$0xff] %v2130_v63  ;;  %1618 = vmatmul.msk.f32.gmra.mxu3 %vm620_vm10, %v3112_v49 }
 0x35d   :  { %v2134_v16 = vpop.eup %2133  ;;  %806 = vst [vmem:[%s3342_s6 + $0x10] sm:$0xff] %v2132_v32 }
 0x35e   :  { %v2136_v41 = vpop.eup %2135  ;;  %807 = vst [vmem:[%s3342_s6 + $0x18] sm:$0xff] %v2134_v16 }
 0x35f   :  { %v2138_v25 = vpop.eup %2137  ;;  %808 = vst [vmem:[%s3342_s6 + $0x20] sm:$0xff] %v2136_v41 }
 0x360   :  { %810 = vst.msk [vmem:[%s3342_s6 + $0x28] sm:$0xff] %vm809_vm12, %v2138_v25 }
 0x362   :  { %1610 = vmatmul.msk.f32.gmra.mxu0 %vm620_vm10, %v3155_v27 }
 0x363   :  { %1616 = vmatmul.msk.f32.gmra.mxu2 %vm620_vm10, %v3155_v27  ;;  %1613 = vmatmul.msk.f32.gmra.mxu1 %vm620_vm10, %v3155_v27 }
 0x364   :  { %1619 = vmatmul.msk.f32.gmra.mxu3 %vm620_vm10, %v3155_v27 }
 0x3ba   :  { %v1374_v58 = vpop.f32.mrf.mxu2  ;;  %v1400_v15 = vpop.f32.mrf.mxu3 }
 0x3bb   :  { %v1375_v43 = vadd.f32 %v1374_v58, %v3182_v45  ;;  %v1401_v39 = vadd.f32 %v1400_v15, %v3182_v45 }
 0x3bd   :  { %2139 = vtanh.f32 %v1375_v43 }
 0x3be   :  { %2141 = vtanh.f32 %v1401_v39 }
 0x3c3   :  { %v2140_v24 = vpop.eup %2139 }
 0x3c4   :  { %v2142_v29 = vpop.eup %2141  ;;  %1620 = vst [vmem:[%s3342_s6 + $0x90] sm:$0xff] %v2140_v24 }
 0x3c5   :  { %1621 = vst [vmem:[%s3342_s6 + $0x98] sm:$0xff] %v2142_v29 }
 0x3c6   :  { %v1377_v28 = vpop.f32.mrf.mxu2  ;;  %v1403_v8 = vpop.f32.mrf.mxu3 }
 0x3c7   :  { %v1378_v13 = vadd.f32 %v1377_v28, %v3149_v10  ;;  %v1404_v44 = vadd.f32 %v1403_v8, %v3149_v10 }
 0x3c9   :  { %2143 = vtanh.f32 %v1378_v13 }
 0x3ca   :  { %2145 = vtanh.f32 %v1404_v44 }
 0x3ce   :  { %v1380_v21 = vpop.f32.mrf.mxu2  ;;  %v1406_v61 = vpop.f32.mrf.mxu3 }
 0x3cf   :  { %v2144_v49 = vpop.eup %2143  ;;  %v1381_v9 = vadd.f32 %v1380_v21, %v3078_v3  ;;  %v1407_v30 = vadd.f32 %v1406_v61, %v3078_v3  ;;  %v1426_v52 = vpop.f32.mrf.mxu0 }
 0x3d0   :  { %v2146_v42 = vpop.eup %2145  ;;  %1626 = vst [vmem:[%s3342_s6 + $0xc0] sm:$0xff] %v2144_v49  ;;  %v1427_v4 = vadd.f32 %v1426_v52, %v3182_v45  ;;  %v1452_v55 = vpop.f32.mrf.mxu1 }
 0x3d1   :  { %1627 = vst [vmem:[%s3342_s6 + $0xc8] sm:$0xff] %v2146_v42  ;;  %2147 = vtanh.f32 %v1381_v9  ;;  %v1453_v0 = vadd.f32 %v1452_v55, %v3182_v45 }
 0x3d2   :  { %2149 = vtanh.f32 %v1407_v30 }
 0x3d3   :  { %2151 = vtanh.f32 %v1427_v4 }
 0x3d4   :  { %2153 = vtanh.f32 %v1453_v0 }
 0x3d6   :  { %v1478_v50 = vpop.f32.mrf.mxu2 }
 0x3d7   :  { %v2148_v2 = vpop.eup %2147  ;;  %v1479_v56 = vadd.f32 %v1478_v50, %v3182_v45  ;;  %v1504_v57 = vpop.f32.mrf.mxu3 }
 0x3d8   :  { %v1429_v6 = vpop.f32.mrf.mxu0  ;;  %v2150_v46 = vpop.eup %2149  ;;  %1632 = vst [vmem:[%s3342_s6 + $0xf0] sm:$0x3f] %v2148_v2  ;;  %v1505_v11 = vadd.f32 %v1504_v57, %v3182_v45 }
 0x3d9   :  { %v1430_v33 = vadd.f32 %v1429_v6, %v3149_v10  ;;  %v2152_v59 = vpop.eup %2151  ;;  %1633 = vst [vmem:[%s3342_s6 + $0xf8] sm:$0x3f] %v2150_v46  ;;  %2155 = vtanh.f32 %v1479_v56  ;;  %v1455_v23 = vpop.f32.mrf.mxu1 }
 0x3da   :  { %v2154_v31 = vpop.eup %2153  ;;  %1622 = vst [vmem:[%s3342_s6 + $0xa0] sm:$0xff] %v2152_v59  ;;  %2157 = vtanh.f32 %v1505_v11  ;;  %v1456_v35 = vadd.f32 %v1455_v23, %v3149_v10 }
 0x3db   :  { %1623 = vst [vmem:[%s3342_s6 + $0xa8] sm:$0xff] %v2154_v31  ;;  %2159 = vtanh.f32 %v1430_v33 }
 0x3dc   :  { %2161 = vtanh.f32 %v1456_v35 }
 0x3de   :  { %v1481_v27 = vpop.f32.mrf.mxu2 }
 0x3df   :  { %v2156_v14 = vpop.eup %2155  ;;  %v1482_v22 = vadd.f32 %v1481_v27, %v3149_v10  ;;  %v1507_v19 = vpop.f32.mrf.mxu3 }
 0x3e0   :  { %v1432_v54 = vpop.f32.mrf.mxu0  ;;  %v2158_v7 = vpop.eup %2157  ;;  %1624 = vst [vmem:[%s3342_s6 + $0xb0] sm:$0xff] %v2156_v14  ;;  %v1508_v48 = vadd.f32 %v1507_v19, %v3149_v10 }
 0x3e1   :  { %v1433_v5 = vadd.f32 %v1432_v54, %v3078_v3  ;;  %v2160_v18 = vpop.eup %2159  ;;  %1625 = vst.msk [vmem:[%s3342_s6 + $0xb8] sm:$0xff] %vm809_vm12, %v2158_v7  ;;  %2163 = vtanh.f32 %v1482_v22  ;;  %v1458_v62 = vpop.f32.mrf.mxu1 }
 0x3e2   :  { %v2162_v45 = vpop.eup %2161  ;;  %1628 = vst [vmem:[%s3342_s6 + $0xd0] sm:$0xff] %v2160_v18  ;;  %2165 = vtanh.f32 %v1508_v48  ;;  %v1459_v51 = vadd.f32 %v1458_v62, %v3078_v3 }
 0x3e3   :  { %1629 = vst [vmem:[%s3342_s6 + $0xd8] sm:$0xff] %v2162_v45  ;;  %2167 = vtanh.f32 %v1433_v5 }
 0x3e4   :  { %2169 = vtanh.f32 %v1459_v51 }
 0x3e6   :  { %v1484_v10 = vpop.f32.mrf.mxu2 }
 0x3e7   :  { %v2164_v37 = vpop.eup %2163  ;;  %v1485_v47 = vadd.f32 %v1484_v10, %v3078_v3  ;;  %v1510_v12 = vpop.f32.mrf.mxu3 }
 0x3e8   :  { %v2166_v40 = vpop.eup %2165  ;;  %1630 = vst [vmem:[%s3342_s6 + $0xe0] sm:$0xff] %v2164_v37  ;;  %v1511_v38 = vadd.f32 %v1510_v12, %v3078_v3 }
 0x3e9   :  { %v2168_v20 = vpop.eup %2167  ;;  %1631 = vst.msk [vmem:[%s3342_s6 + $0xe8] sm:$0xff] %vm809_vm12, %v2166_v40  ;;  %2171 = vtanh.f32 %v1485_v47 }
 0x3ea   :  { %v2170_v1 = vpop.eup %2169  ;;  %1634 = vst [vmem:[%s3342_s6 + $0x100] sm:$0x3f] %v2168_v20  ;;  %2173 = vtanh.f32 %v1511_v38 }
 0x3eb   :  { %1635 = vst [vmem:[%s3342_s6 + $0x108] sm:$0x3f] %v2170_v1 }
 0x3ef   :  { %v2172_v36 = vpop.eup %2171 }
 0x3f0   :  { %v2174_v17 = vpop.eup %2173  ;;  %1636 = vst [vmem:[%s3342_s6 + $0x110] sm:$0x3f] %v2172_v36 }
 0x3f1   :  { %1637 = vst.msk [vmem:[%s3342_s6 + $0x118] sm:$0x3f] %vm822_vm11, %v2174_v17 }

</bundles_post_ra>
